<compile_context>
chip_gen: v7x
topology: tpu7x:2x2x1
jax: 0.10.0
libtpu: 0.0.40
codegen_flags: <defaults>
</compile_context>

<pallas_src>
import functools
import math

import jax
import jax.numpy as jnp
from jax.experimental import pallas as pl
from jax.experimental.pallas import tpu as pltpu

EPS = 1e-5  # PyTorch LayerNorm default eps


# ----------------------------- helpers (used inside kernels) ----------------
def _layernorm(x, gamma, beta):
    mu = jnp.mean(x, axis=-1, keepdims=True)
    var = jnp.mean((x - mu) ** 2, axis=-1, keepdims=True)
    return (x - mu) * jax.lax.rsqrt(var + EPS) * gamma + beta


def _gelu(x):  # exact (erf-based) GELU, matching nn.GELU() default
    return 0.5 * x * (1.0 + jax.lax.erf(x * 0.7071067811865475))


# --------------------- fused ViT_V2 forward kernel ---------------------------
def fused_vit_kernel(
    patches_ref, speed_ref,
    tg1_ref, tb1_ref, tw_ref, tbw_ref, tg2_ref, tb2_ref,
    pos_ref, cls_ref,
    ln1g_ref, ln1b_ref, wqkv_ref, wo_ref, bo_ref,
    ln2g_ref, ln2b_ref, w1_ref, b1_ref, w2_ref, b2_ref,
    hg_ref, hb_ref, hw1_ref, hb1_ref, hw2_ref, hb2_ref,
    o_ref,
    seq_ref,                      # VMEM scratch (S, D): assembled token sequence
    *, depth, heads, dim_head):
    f32 = jnp.float32
    num_patches = patches_ref.shape[1]
    S, D = seq_ref.shape
    scale = 1.0 / math.sqrt(dim_head)

    # ---- Tokenization: LN -> Linear -> LN (this batch element) ----
    p = patches_ref[0]                                       # (num_patches, patch_dim)
    pn = _layernorm(p, tg1_ref[...], tb1_ref[...])
    tok = jnp.dot(pn, tw_ref[...], preferred_element_type=f32) + tbw_ref[...]
    tok = _layernorm(tok, tg2_ref[...], tb2_ref[...])        # (num_patches, D)

    # ---- assemble sequence [patch tokens | speed | cls(2)] + pos ----
    seq_ref[0:num_patches, :] = tok
    seq_ref[num_patches:num_patches + 1, :] = speed_ref[0]
    seq_ref[num_patches + 1:S, :] = cls_ref[...]
    x = seq_ref[...] + pos_ref[...]                          # (S, D)
    # TODO(synk): nn.Dropout with p=0.0 is an identity in this config; omitted.

    # ---- transformer blocks; activations stay resident ----
    for di in range(depth):
        # PreNorm + multi-head self-attention (heads batched, leading dim) + residual
        xn = _layernorm(x, ln1g_ref[di], ln1b_ref[di])
        xb = jnp.broadcast_to(xn, (3 * heads, S, D))
        qkv = jnp.einsum('hsd,hde->hse', xb, wqkv_ref[di],
                         preferred_element_type=f32)         # (3*heads, S, dim_head)
        q = qkv[0:heads] * scale                             # fold 1/sqrt(dh) into q
        k = qkv[heads:2 * heads]
        v = qkv[2 * heads:3 * heads]
        s = jnp.einsum('hqd,hkd->hqk', q, k,
                       preferred_element_type=f32)           # (heads, S, S)
        m = jnp.max(s, axis=-1, keepdims=True)
        e = jnp.exp(s - m)
        prob = e * pl.reciprocal(jnp.sum(e, axis=-1, keepdims=True), approx=True)
        a = jnp.einsum('hqk,hkd->hqd', prob, v,
                       preferred_element_type=f32)           # (heads, S, dim_head)
        oh = jnp.einsum('hqd,hde->hqe', a, wo_ref[di],
                        preferred_element_type=f32)          # (heads, S, D)
        x = jnp.sum(oh, axis=0) + bo_ref[di] + x

        # PreNorm + positionwise FFN (exact GELU) + residual
        yn = _layernorm(x, ln2g_ref[di], ln2b_ref[di])
        h1 = _gelu(jnp.dot(yn, w1_ref[di], preferred_element_type=f32) + b1_ref[di])
        x = jnp.dot(h1, w2_ref[di], preferred_element_type=f32) + b2_ref[di] + x

    # ---- readout: res = [steering(-2) | accel(-1) | speed(-3)] -> MLP head ----
    res = jnp.concatenate(
        [x[S - 2:S - 1, :], x[S - 1:S, :], x[S - 3:S - 2, :]], axis=-1)  # (1, 3*D)
    rn = _layernorm(res, hg_ref[...], hb_ref[...])
    r1 = jnp.dot(rn, hw1_ref[...], preferred_element_type=f32) + hb1_ref[...]
    o_ref[0] = jnp.dot(r1, hw2_ref[...], preferred_element_type=f32) + hb2_ref[...]


# ----------------------------- parameters -----------------------------------
def init_params(key, *, channels, patch, dim, depth, heads, dim_head, mlp_dim,
                num_patches, num_classes):
    patch_dim = patch * patch * channels
    inner = heads * dim_head
    keys = iter(jax.random.split(key, 64))

    def nrm(shape, s=0.02):
        return (s * jax.random.normal(next(keys), shape)).astype(jnp.float32)

    def ones(n):
        return jnp.ones((1, n), jnp.float32)

    params = {}
    params["tok"] = dict(
        g1=ones(patch_dim) + nrm((1, patch_dim)), b1=nrm((1, patch_dim)),
        w=nrm((patch_dim, dim)), bw=nrm((1, dim)),
        g2=ones(dim) + nrm((1, dim)), b2=nrm((1, dim)))
    params["pos"] = nrm((num_patches + 3, dim), 1.0)
    params["cls"] = nrm((2, dim), 1.0)
    params["blocks"] = []
    for _ in range(depth):
        params["blocks"].append(dict(
            ln1g=ones(dim) + nrm((1, dim)), ln1b=nrm((1, dim)),
            wqkv=nrm((dim, 3 * inner)),
            wo=nrm((inner, dim)), bo=nrm((1, dim)),
            ln2g=ones(dim) + nrm((1, dim)), ln2b=nrm((1, dim)),
            w1=nrm((dim, mlp_dim)), b1=nrm((1, mlp_dim)),
            w2=nrm((mlp_dim, dim)), b2=nrm((1, dim))))
    params["head"] = dict(
        g=ones(3 * dim) + nrm((1, 3 * dim)), b=nrm((1, 3 * dim)),
        w1=nrm((3 * dim, 128)), b1=nrm((1, 128)),
        w2=nrm((128, num_classes)), b2=nrm((1, num_classes)))
    return params


# ----------------------------- full forward (one pallas_call) ----------------
def vit_v2_forward(img, speed, params, *, patch, heads, dim_head):
    B, C, H, W = img.shape
    ph = pw = patch
    h, w = H // ph, W // pw
    # rearrange 'b c (h p1) (w p2) -> b (h w) (p1 p2 c)'  (layout glue only)
    x = img.reshape(B, C, h, ph, w, pw)
    x = jnp.transpose(x, (0, 2, 4, 3, 5, 1))                 # (B, h, w, p1, p2, C)
    patches = x.reshape(B, h * w, ph * pw * C)               # (B, num_patches, patch_dim)

    tok = params["tok"]
    dim = tok["w"].shape[1]
    depth = len(params["blocks"])
    num_patches = h * w
    S = num_patches + 3
    patch_dim = ph * pw * C
    mlp_dim = params["blocks"][0]["w1"].shape[1]
    num_classes = params["head"]["w2"].shape[1]

    # Stack per-block weights over depth (one kernel arg each); pre-split the
    # QKV / output-projection weights per head (pure layout, done once in XLA).
    def stack(name):
        return jnp.stack([blk[name] for blk in params["blocks"]], axis=0)

    wqkv_h = jnp.stack(
        [blk["wqkv"].reshape(dim, 3, heads, dim_head)
                     .transpose(1, 2, 0, 3)
                     .reshape(3 * heads, dim, dim_head)
         for blk in params["blocks"]], axis=0)               # (depth, 3*heads, D, dh)
    wo_h = jnp.stack(
        [blk["wo"].reshape(heads, dim_head, dim) for blk in params["blocks"]],
        axis=0)                                              # (depth, heads, dh, D)

    speed3 = speed[:, None, :]                               # (B, 1, D)

    def tiled(shape):
        nd = len(shape)
        return pl.BlockSpec(shape, lambda b, _nd=nd: (b,) + (0,) * (_nd - 1))

    def full(shape):
        nd = len(shape)
        return pl.BlockSpec(shape, lambda b, _nd=nd: (0,) * _nd)

    kernel = functools.partial(fused_vit_kernel, depth=depth, heads=heads,
                               dim_head=dim_head)
    out = pl.pallas_call(
        kernel,
        out_shape=jax.ShapeDtypeStruct((B, 1, num_classes), jnp.float32),
        grid=(B,),
        in_specs=[
            tiled((1, num_patches, patch_dim)),              # patches
            tiled((1, 1, dim)),                              # speed
            full((1, patch_dim)), full((1, patch_dim)),      # tok g1, b1
            full((patch_dim, dim)), full((1, dim)),          # tok w, bw
            full((1, dim)), full((1, dim)),                  # tok g2, b2
            full((S, dim)), full((2, dim)),                  # pos, cls
            full((depth, 1, dim)), full((depth, 1, dim)),    # ln1g, ln1b
            full((depth, 3 * heads, dim, dim_head)),         # wqkv (per head)
            full((depth, heads, dim_head, dim)),             # wo   (per head)
            full((depth, 1, dim)),                           # bo
            full((depth, 1, dim)), full((depth, 1, dim)),    # ln2g, ln2b
            full((depth, dim, mlp_dim)), full((depth, 1, mlp_dim)),   # w1, b1
            full((depth, mlp_dim, dim)), full((depth, 1, dim)),       # w2, b2
            full((1, 3 * dim)), full((1, 3 * dim)),          # head g, b
            full((3 * dim, 128)), full((1, 128)),            # head w1, b1
            full((128, num_classes)), full((1, num_classes)),  # head w2, b2
        ],
        out_specs=pl.BlockSpec((1, 1, num_classes), lambda b: (b, 0, 0)),
        scratch_shapes=[pltpu.VMEM((S, dim), jnp.float32)],
        compiler_params=pltpu.CompilerParams(
            dimension_semantics=("parallel",)),
    )(patches, speed3,
      tok["g1"], tok["b1"], tok["w"], tok["bw"], tok["g2"], tok["b2"],
      params["pos"], params["cls"],
      stack("ln1g"), stack("ln1b"), wqkv_h, wo_h, stack("bo"),
      stack("ln2g"), stack("ln2b"), stack("w1"), stack("b1"),
      stack("w2"), stack("b2"),
      params["head"]["g"], params["head"]["b"],
      params["head"]["w1"], params["head"]["b1"],
      params["head"]["w2"], params["head"]["b2"])
    return out.reshape(B, num_classes)


# ----------------------------- pure-JAX reference ----------------------------
def ref_forward(img, speed, params, *, patch, heads, dim_head):
    B, C, H, W = img.shape
    ph = pw = patch
    h, w = H // ph, W // pw
    x = img.reshape(B, C, h, ph, w, pw)
    x = jnp.transpose(x, (0, 2, 4, 3, 5, 1)).reshape(B, h * w, ph * pw * C)
    t = params["tok"]
    x = _layernorm(x, t["g1"], t["b1"])
    x = x @ t["w"] + t["bw"]
    x = _layernorm(x, t["g2"], t["b2"])
    dim = x.shape[-1]
    out = jnp.concatenate([x, speed[:, None, :]], 1)
    out = jnp.concatenate(
        [out, jnp.broadcast_to(params["cls"][None], (B, 2, dim))], 1)
    out = out + params["pos"][None]
    inner = heads * dim_head
    for p in params["blocks"]:
        xn = _layernorm(out, p["ln1g"], p["ln1b"])
        qkv = xn @ p["wqkv"]
        q, k, v = jnp.split(qkv, 3, axis=-1)

        def split_heads(a):
            return a.reshape(B, a.shape[1], heads, dim_head).transpose(0, 2, 1, 3)

        q, k, v = map(split_heads, (q, k, v))
        s = jnp.einsum("bhqd,bhkd->bhqk", q, k) / math.sqrt(dim_head)
        prob = jax.nn.softmax(s, axis=-1)
        a = jnp.einsum("bhqk,bhkd->bhqd", prob, v)
        a = a.transpose(0, 2, 1, 3).reshape(B, out.shape[1], inner)
        a = a @ p["wo"] + p["bo"]
        y = a + out
        yn = _layernorm(y, p["ln2g"], p["ln2b"])
        h1 = _gelu(yn @ p["w1"] + p["b1"])
        out = h1 @ p["w2"] + p["b2"] + y
    res = jnp.concatenate([out[:, -2, :], out[:, -1, :], out[:, -3, :]], -1)
    hp = params["head"]
    r = _layernorm(res, hp["g"], hp["b"])
    r = r @ hp["w1"] + hp["b1"]
    return r @ hp["w2"] + hp["b2"]


# ----------------------------------- main ------------------------------------
if __name__ == "__main__":
    B, C, IMG, PATCH = 2, 4, 16, 8
    DIM, DEPTH, HEADS, DIM_HEAD, MLP_DIM, NUM_CLASSES = 32, 2, 2, 16, 64, 10
    num_patches = (IMG // PATCH) ** 2

    key = jax.random.PRNGKey(0)
    kp, ki, ks = jax.random.split(key, 3)
    params = init_params(kp, channels=C, patch=PATCH, dim=DIM, depth=DEPTH,
                         heads=HEADS, dim_head=DIM_HEAD, mlp_dim=MLP_DIM,
                         num_patches=num_patches, num_classes=NUM_CLASSES)
    img = jax.random.normal(ki, (B, C, IMG, IMG), jnp.float32)
    speed = jax.random.normal(ks, (B, DIM), jnp.float32)

    fwd = jax.jit(functools.partial(vit_v2_forward, patch=PATCH,
                                    heads=HEADS, dim_head=DIM_HEAD))
    action = fwd(img, speed, params)
    jax.block_until_ready(action)

    expected = ref_forward(img, speed, params, patch=PATCH,
                           heads=HEADS, dim_head=DIM_HEAD)
    assert action.shape == (B, NUM_CLASSES)
    assert jnp.allclose(action, expected, atol=2e-2, rtol=2e-2), \
        (action, expected)
    print("KERNEL_OK")
</pallas_src>

<mosaic_0001>
module attributes {stable_mosaic.version = 11 : i64} {
  func.func @fused_vit_kernel(%arg0: i32, %arg1: memref<1x4x256xf32, #tpu.memory_space<vmem>>, %arg2: memref<1x1x32xf32, #tpu.memory_space<vmem>>, %arg3: memref<1x256xf32, #tpu.memory_space<vmem>>, %arg4: memref<1x256xf32, #tpu.memory_space<vmem>>, %arg5: memref<256x32xf32, #tpu.memory_space<vmem>>, %arg6: memref<1x32xf32, #tpu.memory_space<vmem>>, %arg7: memref<1x32xf32, #tpu.memory_space<vmem>>, %arg8: memref<1x32xf32, #tpu.memory_space<vmem>>, %arg9: memref<7x32xf32, #tpu.memory_space<vmem>>, %arg10: memref<2x32xf32, #tpu.memory_space<vmem>>, %arg11: memref<2x1x32xf32, #tpu.memory_space<vmem>>, %arg12: memref<2x1x32xf32, #tpu.memory_space<vmem>>, %arg13: memref<2x6x32x16xf32, #tpu.memory_space<vmem>>, %arg14: memref<2x2x16x32xf32, #tpu.memory_space<vmem>>, %arg15: memref<2x1x32xf32, #tpu.memory_space<vmem>>, %arg16: memref<2x1x32xf32, #tpu.memory_space<vmem>>, %arg17: memref<2x1x32xf32, #tpu.memory_space<vmem>>, %arg18: memref<2x32x64xf32, #tpu.memory_space<vmem>>, %arg19: memref<2x1x64xf32, #tpu.memory_space<vmem>>, %arg20: memref<2x64x32xf32, #tpu.memory_space<vmem>>, %arg21: memref<2x1x32xf32, #tpu.memory_space<vmem>>, %arg22: memref<1x96xf32, #tpu.memory_space<vmem>>, %arg23: memref<1x96xf32, #tpu.memory_space<vmem>>, %arg24: memref<96x128xf32, #tpu.memory_space<vmem>>, %arg25: memref<1x128xf32, #tpu.memory_space<vmem>>, %arg26: memref<128x10xf32, #tpu.memory_space<vmem>>, %arg27: memref<1x10xf32, #tpu.memory_space<vmem>>, %arg28: memref<1x1x10xf32, #tpu.memory_space<vmem>>, %arg29: memref<7x32xf32, #tpu.memory_space<vmem>>) attributes {dimension_semantics = [#tpu.dimension_semantics<parallel>], iteration_bounds = array<i64: 2>, scalar_prefetch = 0 : i64, scratch_operands = 1 : i64, tpu.core_type = #tpu.core_type<tc>, window_params = [{transform_indices = @transform_0, window_bounds = array<i64: 1, 4, 256>}, {transform_indices = @transform_1, window_bounds = array<i64: 1, 1, 32>}, {pipeline_mode = #tpu.pipeline_mode<synchronous>, transform_indices = @transform_2, window_bounds = array<i64: 1, 256>}, {pipeline_mode = #tpu.pipeline_mode<synchronous>, transform_indices = @transform_3, window_bounds = array<i64: 1, 256>}, {pipeline_mode = #tpu.pipeline_mode<synchronous>, transform_indices = @transform_4, window_bounds = array<i64: 256, 32>}, {pipeline_mode = #tpu.pipeline_mode<synchronous>, transform_indices = @transform_5, window_bounds = array<i64: 1, 32>}, {pipeline_mode = #tpu.pipeline_mode<synchronous>, transform_indices = @transform_6, window_bounds = array<i64: 1, 32>}, {pipeline_mode = #tpu.pipeline_mode<synchronous>, transform_indices = @transform_7, window_bounds = array<i64: 1, 32>}, {pipeline_mode = #tpu.pipeline_mode<synchronous>, transform_indices = @transform_8, window_bounds = array<i64: 7, 32>}, {pipeline_mode = #tpu.pipeline_mode<synchronous>, transform_indices = @transform_9, window_bounds = array<i64: 2, 32>}, {pipeline_mode = #tpu.pipeline_mode<synchronous>, transform_indices = @transform_10, window_bounds = array<i64: 2, 1, 32>}, {pipeline_mode = #tpu.pipeline_mode<synchronous>, transform_indices = @transform_11, window_bounds = array<i64: 2, 1, 32>}, {pipeline_mode = #tpu.pipeline_mode<synchronous>, transform_indices = @transform_12, window_bounds = array<i64: 2, 6, 32, 16>}, {pipeline_mode = #tpu.pipeline_mode<synchronous>, transform_indices = @transform_13, window_bounds = array<i64: 2, 2, 16, 32>}, {pipeline_mode = #tpu.pipeline_mode<synchronous>, transform_indices = @transform_14, window_bounds = array<i64: 2, 1, 32>}, {pipeline_mode = #tpu.pipeline_mode<synchronous>, transform_indices = @transform_15, window_bounds = array<i64: 2, 1, 32>}, {pipeline_mode = #tpu.pipeline_mode<synchronous>, transform_indices = @transform_16, window_bounds = array<i64: 2, 1, 32>}, {pipeline_mode = #tpu.pipeline_mode<synchronous>, transform_indices = @transform_17, window_bounds = array<i64: 2, 32, 64>}, {pipeline_mode = #tpu.pipeline_mode<synchronous>, transform_indices = @transform_18, window_bounds = array<i64: 2, 1, 64>}, {pipeline_mode = #tpu.pipeline_mode<synchronous>, transform_indices = @transform_19, window_bounds = array<i64: 2, 64, 32>}, {pipeline_mode = #tpu.pipeline_mode<synchronous>, transform_indices = @transform_20, window_bounds = array<i64: 2, 1, 32>}, {pipeline_mode = #tpu.pipeline_mode<synchronous>, transform_indices = @transform_21, window_bounds = array<i64: 1, 96>}, {pipeline_mode = #tpu.pipeline_mode<synchronous>, transform_indices = @transform_22, window_bounds = array<i64: 1, 96>}, {pipeline_mode = #tpu.pipeline_mode<synchronous>, transform_indices = @transform_23, window_bounds = array<i64: 96, 128>}, {pipeline_mode = #tpu.pipeline_mode<synchronous>, transform_indices = @transform_24, window_bounds = array<i64: 1, 128>}, {pipeline_mode = #tpu.pipeline_mode<synchronous>, transform_indices = @transform_25, window_bounds = array<i64: 128, 10>}, {pipeline_mode = #tpu.pipeline_mode<synchronous>, transform_indices = @transform_26, window_bounds = array<i64: 1, 10>}, {transform_indices = @transform_27, window_bounds = array<i64: 1, 1, 10>}]} {
    %c0 = arith.constant 0 : index
    %c0_0 = arith.constant 0 : index
    %c0_1 = arith.constant 0 : index
    %0 = vector.load %arg1[%c0, %c0_0, %c0_1] : memref<1x4x256xf32, #tpu.memory_space<vmem>>, vector<1x4x256xf32>
    %1 = vector.shape_cast %0 : vector<1x4x256xf32> to vector<4x256xf32>
    %c0_2 = arith.constant 0 : index
    %c0_3 = arith.constant 0 : index
    %2 = vector.load %arg3[%c0_2, %c0_3] : memref<1x256xf32, #tpu.memory_space<vmem>>, vector<1x256xf32>
    %c0_4 = arith.constant 0 : index
    %c0_5 = arith.constant 0 : index
    %3 = vector.load %arg4[%c0_4, %c0_5] : memref<1x256xf32, #tpu.memory_space<vmem>>, vector<1x256xf32>
    %cst = arith.constant dense<0.000000e+00> : vector<4xf32>
    %4 = vector.multi_reduction <add>, %1, %cst [1] : vector<4x256xf32> to vector<4xf32>
    %5 = vector.shape_cast %4 : vector<4xf32> to vector<4x1xf32>
    %cst_6 = arith.constant 2.560000e+02 : f32
    %6 = vector.broadcast %cst_6 : f32 to vector<4x1xf32>
    %7 = arith.divf %5, %6 : vector<4x1xf32>
    %8 = vector.broadcast %7 : vector<4x1xf32> to vector<4x256xf32>
    %9 = arith.subf %1, %8 : vector<4x256xf32>
    %10 = arith.mulf %9, %9 : vector<4x256xf32>
    %cst_7 = arith.constant dense<0.000000e+00> : vector<4xf32>
    %11 = vector.multi_reduction <add>, %10, %cst_7 [1] : vector<4x256xf32> to vector<4xf32>
    %12 = vector.shape_cast %11 : vector<4xf32> to vector<4x1xf32>
    %cst_8 = arith.constant 2.560000e+02 : f32
    %13 = vector.broadcast %cst_8 : f32 to vector<4x1xf32>
    %14 = arith.divf %12, %13 : vector<4x1xf32>
    %15 = vector.broadcast %7 : vector<4x1xf32> to vector<4x256xf32>
    %16 = arith.subf %1, %15 : vector<4x256xf32>
    %cst_9 = arith.constant 9.99999974E-6 : f32
    %17 = vector.broadcast %cst_9 : f32 to vector<4x1xf32>
    %18 = arith.addf %14, %17 : vector<4x1xf32>
    %19 = math.rsqrt %18 : vector<4x1xf32>
    %20 = vector.broadcast %19 : vector<4x1xf32> to vector<4x256xf32>
    %21 = arith.mulf %16, %20 : vector<4x256xf32>
    %22 = vector.broadcast %2 : vector<1x256xf32> to vector<4x256xf32>
    %23 = arith.mulf %21, %22 : vector<4x256xf32>
    %24 = vector.broadcast %3 : vector<1x256xf32> to vector<4x256xf32>
    %25 = arith.addf %23, %24 : vector<4x256xf32>
    %c0_10 = arith.constant 0 : index
    %c0_11 = arith.constant 0 : index
    %26 = vector.load %arg5[%c0_10, %c0_11] : memref<256x32xf32, #tpu.memory_space<vmem>>, vector<256x32xf32>
    %cst_12 = arith.constant dense<0.000000e+00> : vector<4x32xf32>
    %27 = tpu.matmul %25, %26, %cst_12 {dimension_numbers = #tpu.dot_dimension_numbers<[1], [0], [0], [1], [0, 0, 1, 1], [], []>} : vector<4x256xf32>, vector<256x32xf32>, vector<4x32xf32> -> vector<4x32xf32>
    %c0_13 = arith.constant 0 : index
    %c0_14 = arith.constant 0 : index
    %28 = vector.load %arg6[%c0_13, %c0_14] : memref<1x32xf32, #tpu.memory_space<vmem>>, vector<1x32xf32>
    %29 = vector.broadcast %28 : vector<1x32xf32> to vector<4x32xf32>
    %30 = arith.addf %27, %29 : vector<4x32xf32>
    %c0_15 = arith.constant 0 : index
    %c0_16 = arith.constant 0 : index
    %31 = vector.load %arg7[%c0_15, %c0_16] : memref<1x32xf32, #tpu.memory_space<vmem>>, vector<1x32xf32>
    %c0_17 = arith.constant 0 : index
    %c0_18 = arith.constant 0 : index
    %32 = vector.load %arg8[%c0_17, %c0_18] : memref<1x32xf32, #tpu.memory_space<vmem>>, vector<1x32xf32>
    %cst_19 = arith.constant dense<0.000000e+00> : vector<4xf32>
    %33 = vector.multi_reduction <add>, %30, %cst_19 [1] : vector<4x32xf32> to vector<4xf32>
    %34 = vector.shape_cast %33 : vector<4xf32> to vector<4x1xf32>
    %cst_20 = arith.constant 3.200000e+01 : f32
    %35 = vector.broadcast %cst_20 : f32 to vector<4x1xf32>
    %36 = arith.divf %34, %35 : vector<4x1xf32>
    %37 = vector.broadcast %36 : vector<4x1xf32> to vector<4x32xf32>
    %38 = arith.subf %30, %37 : vector<4x32xf32>
    %39 = arith.mulf %38, %38 : vector<4x32xf32>
    %cst_21 = arith.constant dense<0.000000e+00> : vector<4xf32>
    %40 = vector.multi_reduction <add>, %39, %cst_21 [1] : vector<4x32xf32> to vector<4xf32>
    %41 = vector.shape_cast %40 : vector<4xf32> to vector<4x1xf32>
    %cst_22 = arith.constant 3.200000e+01 : f32
    %42 = vector.broadcast %cst_22 : f32 to vector<4x1xf32>
    %43 = arith.divf %41, %42 : vector<4x1xf32>
    %44 = vector.broadcast %36 : vector<4x1xf32> to vector<4x32xf32>
    %45 = arith.subf %30, %44 : vector<4x32xf32>
    %cst_23 = arith.constant 9.99999974E-6 : f32
    %46 = vector.broadcast %cst_23 : f32 to vector<4x1xf32>
    %47 = arith.addf %43, %46 : vector<4x1xf32>
    %48 = math.rsqrt %47 : vector<4x1xf32>
    %49 = vector.broadcast %48 : vector<4x1xf32> to vector<4x32xf32>
    %50 = arith.mulf %45, %49 : vector<4x32xf32>
    %51 = vector.broadcast %31 : vector<1x32xf32> to vector<4x32xf32>
    %52 = arith.mulf %50, %51 : vector<4x32xf32>
    %53 = vector.broadcast %32 : vector<1x32xf32> to vector<4x32xf32>
    %54 = arith.addf %52, %53 : vector<4x32xf32>
    %c0_24 = arith.constant 0 : index
    %c0_25 = arith.constant 0 : index
    %55 = vector.load %arg29[%c0_24, %c0_25] : memref<7x32xf32, #tpu.memory_space<vmem>>, vector<4x32xf32>
    tpu.vector_store %arg29[%c0_24, %c0_25], %54 {strides = array<i32>} : memref<7x32xf32, #tpu.memory_space<vmem>>, vector<4x32xf32>,
    %c0_26 = arith.constant 0 : index
    %c0_27 = arith.constant 0 : index
    %c0_28 = arith.constant 0 : index
    %56 = vector.load %arg2[%c0_26, %c0_27, %c0_28] : memref<1x1x32xf32, #tpu.memory_space<vmem>>, vector<1x1x32xf32>
    %57 = vector.shape_cast %56 : vector<1x1x32xf32> to vector<1x32xf32>
    %c4 = arith.constant 4 : index
    %c0_29 = arith.constant 0 : index
    %58 = vector.load %arg29[%c4, %c0_29] : memref<7x32xf32, #tpu.memory_space<vmem>>, vector<1x32xf32>
    tpu.vector_store %arg29[%c4, %c0_29], %57 {strides = array<i32>} : memref<7x32xf32, #tpu.memory_space<vmem>>, vector<1x32xf32>,
    %c0_30 = arith.constant 0 : index
    %c0_31 = arith.constant 0 : index
    %59 = vector.load %arg10[%c0_30, %c0_31] : memref<2x32xf32, #tpu.memory_space<vmem>>, vector<2x32xf32>
    %c5 = arith.constant 5 : index
    %c0_32 = arith.constant 0 : index
    %60 = vector.load %arg29[%c5, %c0_32] : memref<7x32xf32, #tpu.memory_space<vmem>>, vector<2x32xf32>
    tpu.vector_store %arg29[%c5, %c0_32], %59 {strides = array<i32>} : memref<7x32xf32, #tpu.memory_space<vmem>>, vector<2x32xf32>,
    %c0_33 = arith.constant 0 : index
    %c0_34 = arith.constant 0 : index
    %61 = vector.load %arg29[%c0_33, %c0_34] : memref<7x32xf32, #tpu.memory_space<vmem>>, vector<7x32xf32>
    %c0_35 = arith.constant 0 : index
    %c0_36 = arith.constant 0 : index
    %62 = vector.load %arg9[%c0_35, %c0_36] : memref<7x32xf32, #tpu.memory_space<vmem>>, vector<7x32xf32>
    %63 = arith.addf %61, %62 : vector<7x32xf32>
    %c0_37 = arith.constant 0 : index
    %c0_38 = arith.constant 0 : index
    %c0_39 = arith.constant 0 : index
    %64 = vector.load %arg11[%c0_37, %c0_38, %c0_39] : memref<2x1x32xf32, #tpu.memory_space<vmem>>, vector<1x1x32xf32>
    %65 = vector.shape_cast %64 : vector<1x1x32xf32> to vector<1x32xf32>
    %c0_40 = arith.constant 0 : index
    %c0_41 = arith.constant 0 : index
    %c0_42 = arith.constant 0 : index
    %66 = vector.load %arg12[%c0_40, %c0_41, %c0_42] : memref<2x1x32xf32, #tpu.memory_space<vmem>>, vector<1x1x32xf32>
    %67 = vector.shape_cast %66 : vector<1x1x32xf32> to vector<1x32xf32>
    %cst_43 = arith.constant dense<0.000000e+00> : vector<7xf32>
    %68 = vector.multi_reduction <add>, %63, %cst_43 [1] : vector<7x32xf32> to vector<7xf32>
    %69 = vector.shape_cast %68 : vector<7xf32> to vector<7x1xf32>
    %cst_44 = arith.constant 3.200000e+01 : f32
    %70 = vector.broadcast %cst_44 : f32 to vector<7x1xf32>
    %71 = arith.divf %69, %70 : vector<7x1xf32>
    %72 = vector.broadcast %71 : vector<7x1xf32> to vector<7x32xf32>
    %73 = arith.subf %63, %72 : vector<7x32xf32>
    %74 = arith.mulf %73, %73 : vector<7x32xf32>
    %cst_45 = arith.constant dense<0.000000e+00> : vector<7xf32>
    %75 = vector.multi_reduction <add>, %74, %cst_45 [1] : vector<7x32xf32> to vector<7xf32>
    %76 = vector.shape_cast %75 : vector<7xf32> to vector<7x1xf32>
    %cst_46 = arith.constant 3.200000e+01 : f32
    %77 = vector.broadcast %cst_46 : f32 to vector<7x1xf32>
    %78 = arith.divf %76, %77 : vector<7x1xf32>
    %79 = vector.broadcast %71 : vector<7x1xf32> to vector<7x32xf32>
    %80 = arith.subf %63, %79 : vector<7x32xf32>
    %cst_47 = arith.constant 9.99999974E-6 : f32
    %81 = vector.broadcast %cst_47 : f32 to vector<7x1xf32>
    %82 = arith.addf %78, %81 : vector<7x1xf32>
    %83 = math.rsqrt %82 : vector<7x1xf32>
    %84 = vector.broadcast %83 : vector<7x1xf32> to vector<7x32xf32>
    %85 = arith.mulf %80, %84 : vector<7x32xf32>
    %86 = vector.broadcast %65 : vector<1x32xf32> to vector<7x32xf32>
    %87 = arith.mulf %85, %86 : vector<7x32xf32>
    %88 = vector.broadcast %67 : vector<1x32xf32> to vector<7x32xf32>
    %89 = arith.addf %87, %88 : vector<7x32xf32>
    %90 = vector.shape_cast %89 : vector<7x32xf32> to vector<1x7x32xf32>
    %91 = vector.broadcast %90 : vector<1x7x32xf32> to vector<6x7x32xf32>
    %c0_48 = arith.constant 0 : index
    %c0_49 = arith.constant 0 : index
    %c0_50 = arith.constant 0 : index
    %c0_51 = arith.constant 0 : index
    %92 = vector.load %arg13[%c0_48, %c0_49, %c0_50, %c0_51] : memref<2x6x32x16xf32, #tpu.memory_space<vmem>>, vector<1x6x32x16xf32>
    %93 = vector.shape_cast %92 : vector<1x6x32x16xf32> to vector<6x32x16xf32>
    "tpu.trace_start"() <{level = 10 : i32, message = "hsd,hde->hse"}> : () -> ()
    %cst_52 = arith.constant dense<0.000000e+00> : vector<6x7x16xf32>
    %94 = tpu.matmul %91, %93, %cst_52 {dimension_numbers = #tpu.dot_dimension_numbers<[2], [1], [1], [2], [0, 0, 0, 1, 1, 2], [0], [0]>} : vector<6x7x32xf32>, vector<6x32x16xf32>, vector<6x7x16xf32> -> vector<6x7x16xf32>
    "tpu.trace_stop"() : () -> ()
    %95 = vector.extract_strided_slice %94 {offsets = [0, 0, 0], sizes = [2, 7, 16], strides = [1, 1, 1]} : vector<6x7x16xf32> to vector<2x7x16xf32>
    %cst_53 = arith.constant 2.500000e-01 : f32
    %96 = vector.broadcast %cst_53 : f32 to vector<2x7x16xf32>
    %97 = arith.mulf %95, %96 : vector<2x7x16xf32>
    %98 = vector.extract_strided_slice %94 {offsets = [2, 0, 0], sizes = [2, 7, 16], strides = [1, 1, 1]} : vector<6x7x16xf32> to vector<2x7x16xf32>
    %99 = vector.extract_strided_slice %94 {offsets = [4, 0, 0], sizes = [2, 7, 16], strides = [1, 1, 1]} : vector<6x7x16xf32> to vector<2x7x16xf32>
    "tpu.trace_start"() <{level = 10 : i32, message = "hqd,hkd->hqk"}> : () -> ()
    %cst_54 = arith.constant dense<0.000000e+00> : vector<2x7x7xf32>
    %100 = tpu.matmul %97, %98, %cst_54 {dimension_numbers = #tpu.dot_dimension_numbers<[2], [2], [1], [1], [0, 0, 0, 1, 1, 1], [0], [0]>} : vector<2x7x16xf32>, vector<2x7x16xf32>, vector<2x7x7xf32> -> vector<2x7x7xf32>
    "tpu.trace_stop"() : () -> ()
    %cst_55 = arith.constant dense<0xFF800000> : vector<2x7xf32>
    %101 = vector.multi_reduction <maximumf>, %100, %cst_55 [2] : vector<2x7x7xf32> to vector<2x7xf32>
    %102 = vector.shape_cast %101 : vector<2x7xf32> to vector<2x7x1xf32>
    %103 = vector.broadcast %102 : vector<2x7x1xf32> to vector<2x7x7xf32>
    %104 = arith.subf %100, %103 : vector<2x7x7xf32>
    %105 = math.exp %104 : vector<2x7x7xf32>
    %cst_56 = arith.constant dense<0.000000e+00> : vector<2x7xf32>
    %106 = vector.multi_reduction <add>, %105, %cst_56 [2] : vector<2x7x7xf32> to vector<2x7xf32>
    %107 = vector.shape_cast %106 : vector<2x7xf32> to vector<2x7x1xf32>
    %108 = tpu.reciprocal %107 {approx = true} : vector<2x7x1xf32> -> vector<2x7x1xf32>
    %109 = vector.broadcast %108 : vector<2x7x1xf32> to vector<2x7x7xf32>
    %110 = arith.mulf %105, %109 : vector<2x7x7xf32>
    "tpu.trace_start"() <{level = 10 : i32, message = "hqk,hkd->hqd"}> : () -> ()
    %cst_57 = arith.constant dense<0.000000e+00> : vector<2x7x16xf32>
    %111 = tpu.matmul %110, %99, %cst_57 {dimension_numbers = #tpu.dot_dimension_numbers<[2], [1], [1], [2], [0, 0, 0, 1, 1, 2], [0], [0]>} : vector<2x7x7xf32>, vector<2x7x16xf32>, vector<2x7x16xf32> -> vector<2x7x16xf32>
    "tpu.trace_stop"() : () -> ()
    %c0_58 = arith.constant 0 : index
    %c0_59 = arith.constant 0 : index
    %c0_60 = arith.constant 0 : index
    %c0_61 = arith.constant 0 : index
    %112 = vector.load %arg14[%c0_58, %c0_59, %c0_60, %c0_61] : memref<2x2x16x32xf32, #tpu.memory_space<vmem>>, vector<1x2x16x32xf32>
    %113 = vector.shape_cast %112 : vector<1x2x16x32xf32> to vector<2x16x32xf32>
    "tpu.trace_start"() <{level = 10 : i32, message = "hqd,hde->hqe"}> : () -> ()
    %cst_62 = arith.constant dense<0.000000e+00> : vector<2x7x32xf32>
    %114 = tpu.matmul %111, %113, %cst_62 {dimension_numbers = #tpu.dot_dimension_numbers<[2], [1], [1], [2], [0, 0, 0, 1, 1, 2], [0], [0]>} : vector<2x7x16xf32>, vector<2x16x32xf32>, vector<2x7x32xf32> -> vector<2x7x32xf32>
    "tpu.trace_stop"() : () -> ()
    %cst_63 = arith.constant dense<0.000000e+00> : vector<7x32xf32>
    %115 = vector.multi_reduction <add>, %114, %cst_63 [0] : vector<2x7x32xf32> to vector<7x32xf32>
    %c0_64 = arith.constant 0 : index
    %c0_65 = arith.constant 0 : index
    %c0_66 = arith.constant 0 : index
    %116 = vector.load %arg15[%c0_64, %c0_65, %c0_66] : memref<2x1x32xf32, #tpu.memory_space<vmem>>, vector<1x1x32xf32>
    %117 = vector.shape_cast %116 : vector<1x1x32xf32> to vector<1x32xf32>
    %118 = vector.broadcast %117 : vector<1x32xf32> to vector<7x32xf32>
    %119 = arith.addf %115, %118 : vector<7x32xf32>
    %120 = arith.addf %119, %63 : vector<7x32xf32>
    %c0_67 = arith.constant 0 : index
    %c0_68 = arith.constant 0 : index
    %c0_69 = arith.constant 0 : index
    %121 = vector.load %arg16[%c0_67, %c0_68, %c0_69] : memref<2x1x32xf32, #tpu.memory_space<vmem>>, vector<1x1x32xf32>
    %122 = vector.shape_cast %121 : vector<1x1x32xf32> to vector<1x32xf32>
    %c0_70 = arith.constant 0 : index
    %c0_71 = arith.constant 0 : index
    %c0_72 = arith.constant 0 : index
    %123 = vector.load %arg17[%c0_70, %c0_71, %c0_72] : memref<2x1x32xf32, #tpu.memory_space<vmem>>, vector<1x1x32xf32>
    %124 = vector.shape_cast %123 : vector<1x1x32xf32> to vector<1x32xf32>
    %cst_73 = arith.constant dense<0.000000e+00> : vector<7xf32>
    %125 = vector.multi_reduction <add>, %120, %cst_73 [1] : vector<7x32xf32> to vector<7xf32>
    %126 = vector.shape_cast %125 : vector<7xf32> to vector<7x1xf32>
    %cst_74 = arith.constant 3.200000e+01 : f32
    %127 = vector.broadcast %cst_74 : f32 to vector<7x1xf32>
    %128 = arith.divf %126, %127 : vector<7x1xf32>
    %129 = vector.broadcast %128 : vector<7x1xf32> to vector<7x32xf32>
    %130 = arith.subf %120, %129 : vector<7x32xf32>
    %131 = arith.mulf %130, %130 : vector<7x32xf32>
    %cst_75 = arith.constant dense<0.000000e+00> : vector<7xf32>
    %132 = vector.multi_reduction <add>, %131, %cst_75 [1] : vector<7x32xf32> to vector<7xf32>
    %133 = vector.shape_cast %132 : vector<7xf32> to vector<7x1xf32>
    %cst_76 = arith.constant 3.200000e+01 : f32
    %134 = vector.broadcast %cst_76 : f32 to vector<7x1xf32>
    %135 = arith.divf %133, %134 : vector<7x1xf32>
    %136 = vector.broadcast %128 : vector<7x1xf32> to vector<7x32xf32>
    %137 = arith.subf %120, %136 : vector<7x32xf32>
    %cst_77 = arith.constant 9.99999974E-6 : f32
    %138 = vector.broadcast %cst_77 : f32 to vector<7x1xf32>
    %139 = arith.addf %135, %138 : vector<7x1xf32>
    %140 = math.rsqrt %139 : vector<7x1xf32>
    %141 = vector.broadcast %140 : vector<7x1xf32> to vector<7x32xf32>
    %142 = arith.mulf %137, %141 : vector<7x32xf32>
    %143 = vector.broadcast %122 : vector<1x32xf32> to vector<7x32xf32>
    %144 = arith.mulf %142, %143 : vector<7x32xf32>
    %145 = vector.broadcast %124 : vector<1x32xf32> to vector<7x32xf32>
    %146 = arith.addf %144, %145 : vector<7x32xf32>
    %c0_78 = arith.constant 0 : index
    %c0_79 = arith.constant 0 : index
    %c0_80 = arith.constant 0 : index
    %147 = vector.load %arg18[%c0_78, %c0_79, %c0_80] : memref<2x32x64xf32, #tpu.memory_space<vmem>>, vector<1x32x64xf32>
    %148 = vector.shape_cast %147 : vector<1x32x64xf32> to vector<32x64xf32>
    %cst_81 = arith.constant dense<0.000000e+00> : vector<7x64xf32>
    %149 = tpu.matmul %146, %148, %cst_81 {dimension_numbers = #tpu.dot_dimension_numbers<[1], [0], [0], [1], [0, 0, 1, 1], [], []>} : vector<7x32xf32>, vector<32x64xf32>, vector<7x64xf32> -> vector<7x64xf32>
    %c0_82 = arith.constant 0 : index
    %c0_83 = arith.constant 0 : index
    %c0_84 = arith.constant 0 : index
    %150 = vector.load %arg19[%c0_82, %c0_83, %c0_84] : memref<2x1x64xf32, #tpu.memory_space<vmem>>, vector<1x1x64xf32>
    %151 = vector.shape_cast %150 : vector<1x1x64xf32> to vector<1x64xf32>
    %152 = vector.broadcast %151 : vector<1x64xf32> to vector<7x64xf32>
    %153 = arith.addf %149, %152 : vector<7x64xf32>
    %cst_85 = arith.constant 5.000000e-01 : f32
    %154 = vector.broadcast %cst_85 : f32 to vector<7x64xf32>
    %155 = arith.mulf %154, %153 : vector<7x64xf32>
    %cst_86 = arith.constant 0.707106769 : f32
    %156 = vector.broadcast %cst_86 : f32 to vector<7x64xf32>
    %157 = arith.mulf %153, %156 : vector<7x64xf32>
    %158 = math.erf %157 : vector<7x64xf32>
    %cst_87 = arith.constant 1.000000e+00 : f32
    %159 = vector.broadcast %cst_87 : f32 to vector<7x64xf32>
    %160 = arith.addf %159, %158 : vector<7x64xf32>
    %161 = arith.mulf %155, %160 : vector<7x64xf32>
    %c0_88 = arith.constant 0 : index
    %c0_89 = arith.constant 0 : index
    %c0_90 = arith.constant 0 : index
    %162 = vector.load %arg20[%c0_88, %c0_89, %c0_90] : memref<2x64x32xf32, #tpu.memory_space<vmem>>, vector<1x64x32xf32>
    %163 = vector.shape_cast %162 : vector<1x64x32xf32> to vector<64x32xf32>
    %cst_91 = arith.constant dense<0.000000e+00> : vector<7x32xf32>
    %164 = tpu.matmul %161, %163, %cst_91 {dimension_numbers = #tpu.dot_dimension_numbers<[1], [0], [0], [1], [0, 0, 1, 1], [], []>} : vector<7x64xf32>, vector<64x32xf32>, vector<7x32xf32> -> vector<7x32xf32>
    %c0_92 = arith.constant 0 : index
    %c0_93 = arith.constant 0 : index
    %c0_94 = arith.constant 0 : index
    %165 = vector.load %arg21[%c0_92, %c0_93, %c0_94] : memref<2x1x32xf32, #tpu.memory_space<vmem>>, vector<1x1x32xf32>
    %166 = vector.shape_cast %165 : vector<1x1x32xf32> to vector<1x32xf32>
    %167 = vector.broadcast %166 : vector<1x32xf32> to vector<7x32xf32>
    %168 = arith.addf %164, %167 : vector<7x32xf32>
    %169 = arith.addf %168, %120 : vector<7x32xf32>
    %c1 = arith.constant 1 : index
    %c0_95 = arith.constant 0 : index
    %c0_96 = arith.constant 0 : index
    %170 = vector.load %arg11[%c1, %c0_95, %c0_96] : memref<2x1x32xf32, #tpu.memory_space<vmem>>, vector<1x1x32xf32>
    %171 = vector.shape_cast %170 : vector<1x1x32xf32> to vector<1x32xf32>
    %c1_97 = arith.constant 1 : index
    %c0_98 = arith.constant 0 : index
    %c0_99 = arith.constant 0 : index
    %172 = vector.load %arg12[%c1_97, %c0_98, %c0_99] : memref<2x1x32xf32, #tpu.memory_space<vmem>>, vector<1x1x32xf32>
    %173 = vector.shape_cast %172 : vector<1x1x32xf32> to vector<1x32xf32>
    %cst_100 = arith.constant dense<0.000000e+00> : vector<7xf32>
    %174 = vector.multi_reduction <add>, %169, %cst_100 [1] : vector<7x32xf32> to vector<7xf32>
    %175 = vector.shape_cast %174 : vector<7xf32> to vector<7x1xf32>
    %cst_101 = arith.constant 3.200000e+01 : f32
    %176 = vector.broadcast %cst_101 : f32 to vector<7x1xf32>
    %177 = arith.divf %175, %176 : vector<7x1xf32>
    %178 = vector.broadcast %177 : vector<7x1xf32> to vector<7x32xf32>
    %179 = arith.subf %169, %178 : vector<7x32xf32>
    %180 = arith.mulf %179, %179 : vector<7x32xf32>
    %cst_102 = arith.constant dense<0.000000e+00> : vector<7xf32>
    %181 = vector.multi_reduction <add>, %180, %cst_102 [1] : vector<7x32xf32> to vector<7xf32>
    %182 = vector.shape_cast %181 : vector<7xf32> to vector<7x1xf32>
    %cst_103 = arith.constant 3.200000e+01 : f32
    %183 = vector.broadcast %cst_103 : f32 to vector<7x1xf32>
    %184 = arith.divf %182, %183 : vector<7x1xf32>
    %185 = vector.broadcast %177 : vector<7x1xf32> to vector<7x32xf32>
    %186 = arith.subf %169, %185 : vector<7x32xf32>
    %cst_104 = arith.constant 9.99999974E-6 : f32
    %187 = vector.broadcast %cst_104 : f32 to vector<7x1xf32>
    %188 = arith.addf %184, %187 : vector<7x1xf32>
    %189 = math.rsqrt %188 : vector<7x1xf32>
    %190 = vector.broadcast %189 : vector<7x1xf32> to vector<7x32xf32>
    %191 = arith.mulf %186, %190 : vector<7x32xf32>
    %192 = vector.broadcast %171 : vector<1x32xf32> to vector<7x32xf32>
    %193 = arith.mulf %191, %192 : vector<7x32xf32>
    %194 = vector.broadcast %173 : vector<1x32xf32> to vector<7x32xf32>
    %195 = arith.addf %193, %194 : vector<7x32xf32>
    %196 = vector.shape_cast %195 : vector<7x32xf32> to vector<1x7x32xf32>
    %197 = vector.broadcast %196 : vector<1x7x32xf32> to vector<6x7x32xf32>
    %c1_105 = arith.constant 1 : index
    %c0_106 = arith.constant 0 : index
    %c0_107 = arith.constant 0 : index
    %c0_108 = arith.constant 0 : index
    %198 = vector.load %arg13[%c1_105, %c0_106, %c0_107, %c0_108] : memref<2x6x32x16xf32, #tpu.memory_space<vmem>>, vector<1x6x32x16xf32>
    %199 = vector.shape_cast %198 : vector<1x6x32x16xf32> to vector<6x32x16xf32>
    "tpu.trace_start"() <{level = 10 : i32, message = "hsd,hde->hse"}> : () -> ()
    %cst_109 = arith.constant dense<0.000000e+00> : vector<6x7x16xf32>
    %200 = tpu.matmul %197, %199, %cst_109 {dimension_numbers = #tpu.dot_dimension_numbers<[2], [1], [1], [2], [0, 0, 0, 1, 1, 2], [0], [0]>} : vector<6x7x32xf32>, vector<6x32x16xf32>, vector<6x7x16xf32> -> vector<6x7x16xf32>
    "tpu.trace_stop"() : () -> ()
    %201 = vector.extract_strided_slice %200 {offsets = [0, 0, 0], sizes = [2, 7, 16], strides = [1, 1, 1]} : vector<6x7x16xf32> to vector<2x7x16xf32>
    %cst_110 = arith.constant 2.500000e-01 : f32
    %202 = vector.broadcast %cst_110 : f32 to vector<2x7x16xf32>
    %203 = arith.mulf %201, %202 : vector<2x7x16xf32>
    %204 = vector.extract_strided_slice %200 {offsets = [2, 0, 0], sizes = [2, 7, 16], strides = [1, 1, 1]} : vector<6x7x16xf32> to vector<2x7x16xf32>
    %205 = vector.extract_strided_slice %200 {offsets = [4, 0, 0], sizes = [2, 7, 16], strides = [1, 1, 1]} : vector<6x7x16xf32> to vector<2x7x16xf32>
    "tpu.trace_start"() <{level = 10 : i32, message = "hqd,hkd->hqk"}> : () -> ()
    %cst_111 = arith.constant dense<0.000000e+00> : vector<2x7x7xf32>
    %206 = tpu.matmul %203, %204, %cst_111 {dimension_numbers = #tpu.dot_dimension_numbers<[2], [2], [1], [1], [0, 0, 0, 1, 1, 1], [0], [0]>} : vector<2x7x16xf32>, vector<2x7x16xf32>, vector<2x7x7xf32> -> vector<2x7x7xf32>
    "tpu.trace_stop"() : () -> ()
    %cst_112 = arith.constant dense<0xFF800000> : vector<2x7xf32>
    %207 = vector.multi_reduction <maximumf>, %206, %cst_112 [2] : vector<2x7x7xf32> to vector<2x7xf32>
    %208 = vector.shape_cast %207 : vector<2x7xf32> to vector<2x7x1xf32>
    %209 = vector.broadcast %208 : vector<2x7x1xf32> to vector<2x7x7xf32>
    %210 = arith.subf %206, %209 : vector<2x7x7xf32>
    %211 = math.exp %210 : vector<2x7x7xf32>
    %cst_113 = arith.constant dense<0.000000e+00> : vector<2x7xf32>
    %212 = vector.multi_reduction <add>, %211, %cst_113 [2] : vector<2x7x7xf32> to vector<2x7xf32>
    %213 = vector.shape_cast %212 : vector<2x7xf32> to vector<2x7x1xf32>
    %214 = tpu.reciprocal %213 {approx = true} : vector<2x7x1xf32> -> vector<2x7x1xf32>
    %215 = vector.broadcast %214 : vector<2x7x1xf32> to vector<2x7x7xf32>
    %216 = arith.mulf %211, %215 : vector<2x7x7xf32>
    "tpu.trace_start"() <{level = 10 : i32, message = "hqk,hkd->hqd"}> : () -> ()
    %cst_114 = arith.constant dense<0.000000e+00> : vector<2x7x16xf32>
    %217 = tpu.matmul %216, %205, %cst_114 {dimension_numbers = #tpu.dot_dimension_numbers<[2], [1], [1], [2], [0, 0, 0, 1, 1, 2], [0], [0]>} : vector<2x7x7xf32>, vector<2x7x16xf32>, vector<2x7x16xf32> -> vector<2x7x16xf32>
    "tpu.trace_stop"() : () -> ()
    %c1_115 = arith.constant 1 : index
    %c0_116 = arith.constant 0 : index
    %c0_117 = arith.constant 0 : index
    %c0_118 = arith.constant 0 : index
    %218 = vector.load %arg14[%c1_115, %c0_116, %c0_117, %c0_118] : memref<2x2x16x32xf32, #tpu.memory_space<vmem>>, vector<1x2x16x32xf32>
    %219 = vector.shape_cast %218 : vector<1x2x16x32xf32> to vector<2x16x32xf32>
    "tpu.trace_start"() <{level = 10 : i32, message = "hqd,hde->hqe"}> : () -> ()
    %cst_119 = arith.constant dense<0.000000e+00> : vector<2x7x32xf32>
    %220 = tpu.matmul %217, %219, %cst_119 {dimension_numbers = #tpu.dot_dimension_numbers<[2], [1], [1], [2], [0, 0, 0, 1, 1, 2], [0], [0]>} : vector<2x7x16xf32>, vector<2x16x32xf32>, vector<2x7x32xf32> -> vector<2x7x32xf32>
    "tpu.trace_stop"() : () -> ()
    %cst_120 = arith.constant dense<0.000000e+00> : vector<7x32xf32>
    %221 = vector.multi_reduction <add>, %220, %cst_120 [0] : vector<2x7x32xf32> to vector<7x32xf32>
    %c1_121 = arith.constant 1 : index
    %c0_122 = arith.constant 0 : index
    %c0_123 = arith.constant 0 : index
    %222 = vector.load %arg15[%c1_121, %c0_122, %c0_123] : memref<2x1x32xf32, #tpu.memory_space<vmem>>, vector<1x1x32xf32>
    %223 = vector.shape_cast %222 : vector<1x1x32xf32> to vector<1x32xf32>
    %224 = vector.broadcast %223 : vector<1x32xf32> to vector<7x32xf32>
    %225 = arith.addf %221, %224 : vector<7x32xf32>
    %226 = arith.addf %225, %169 : vector<7x32xf32>
    %c1_124 = arith.constant 1 : index
    %c0_125 = arith.constant 0 : index
    %c0_126 = arith.constant 0 : index
    %227 = vector.load %arg16[%c1_124, %c0_125, %c0_126] : memref<2x1x32xf32, #tpu.memory_space<vmem>>, vector<1x1x32xf32>
    %228 = vector.shape_cast %227 : vector<1x1x32xf32> to vector<1x32xf32>
    %c1_127 = arith.constant 1 : index
    %c0_128 = arith.constant 0 : index
    %c0_129 = arith.constant 0 : index
    %229 = vector.load %arg17[%c1_127, %c0_128, %c0_129] : memref<2x1x32xf32, #tpu.memory_space<vmem>>, vector<1x1x32xf32>
    %230 = vector.shape_cast %229 : vector<1x1x32xf32> to vector<1x32xf32>
    %cst_130 = arith.constant dense<0.000000e+00> : vector<7xf32>
    %231 = vector.multi_reduction <add>, %226, %cst_130 [1] : vector<7x32xf32> to vector<7xf32>
    %232 = vector.shape_cast %231 : vector<7xf32> to vector<7x1xf32>
    %cst_131 = arith.constant 3.200000e+01 : f32
    %233 = vector.broadcast %cst_131 : f32 to vector<7x1xf32>
    %234 = arith.divf %232, %233 : vector<7x1xf32>
    %235 = vector.broadcast %234 : vector<7x1xf32> to vector<7x32xf32>
    %236 = arith.subf %226, %235 : vector<7x32xf32>
    %237 = arith.mulf %236, %236 : vector<7x32xf32>
    %cst_132 = arith.constant dense<0.000000e+00> : vector<7xf32>
    %238 = vector.multi_reduction <add>, %237, %cst_132 [1] : vector<7x32xf32> to vector<7xf32>
    %239 = vector.shape_cast %238 : vector<7xf32> to vector<7x1xf32>
    %cst_133 = arith.constant 3.200000e+01 : f32
    %240 = vector.broadcast %cst_133 : f32 to vector<7x1xf32>
    %241 = arith.divf %239, %240 : vector<7x1xf32>
    %242 = vector.broadcast %234 : vector<7x1xf32> to vector<7x32xf32>
    %243 = arith.subf %226, %242 : vector<7x32xf32>
    %cst_134 = arith.constant 9.99999974E-6 : f32
    %244 = vector.broadcast %cst_134 : f32 to vector<7x1xf32>
    %245 = arith.addf %241, %244 : vector<7x1xf32>
    %246 = math.rsqrt %245 : vector<7x1xf32>
    %247 = vector.broadcast %246 : vector<7x1xf32> to vector<7x32xf32>
    %248 = arith.mulf %243, %247 : vector<7x32xf32>
    %249 = vector.broadcast %228 : vector<1x32xf32> to vector<7x32xf32>
    %250 = arith.mulf %248, %249 : vector<7x32xf32>
    %251 = vector.broadcast %230 : vector<1x32xf32> to vector<7x32xf32>
    %252 = arith.addf %250, %251 : vector<7x32xf32>
    %c1_135 = arith.constant 1 : index
    %c0_136 = arith.constant 0 : index
    %c0_137 = arith.constant 0 : index
    %253 = vector.load %arg18[%c1_135, %c0_136, %c0_137] : memref<2x32x64xf32, #tpu.memory_space<vmem>>, vector<1x32x64xf32>
    %254 = vector.shape_cast %253 : vector<1x32x64xf32> to vector<32x64xf32>
    %cst_138 = arith.constant dense<0.000000e+00> : vector<7x64xf32>
    %255 = tpu.matmul %252, %254, %cst_138 {dimension_numbers = #tpu.dot_dimension_numbers<[1], [0], [0], [1], [0, 0, 1, 1], [], []>} : vector<7x32xf32>, vector<32x64xf32>, vector<7x64xf32> -> vector<7x64xf32>
    %c1_139 = arith.constant 1 : index
    %c0_140 = arith.constant 0 : index
    %c0_141 = arith.constant 0 : index
    %256 = vector.load %arg19[%c1_139, %c0_140, %c0_141] : memref<2x1x64xf32, #tpu.memory_space<vmem>>, vector<1x1x64xf32>
    %257 = vector.shape_cast %256 : vector<1x1x64xf32> to vector<1x64xf32>
    %258 = vector.broadcast %257 : vector<1x64xf32> to vector<7x64xf32>
    %259 = arith.addf %255, %258 : vector<7x64xf32>
    %cst_142 = arith.constant 5.000000e-01 : f32
    %260 = vector.broadcast %cst_142 : f32 to vector<7x64xf32>
    %261 = arith.mulf %260, %259 : vector<7x64xf32>
    %cst_143 = arith.constant 0.707106769 : f32
    %262 = vector.broadcast %cst_143 : f32 to vector<7x64xf32>
    %263 = arith.mulf %259, %262 : vector<7x64xf32>
    %264 = math.erf %263 : vector<7x64xf32>
    %cst_144 = arith.constant 1.000000e+00 : f32
    %265 = vector.broadcast %cst_144 : f32 to vector<7x64xf32>
    %266 = arith.addf %265, %264 : vector<7x64xf32>
    %267 = arith.mulf %261, %266 : vector<7x64xf32>
    %c1_145 = arith.constant 1 : index
    %c0_146 = arith.constant 0 : index
    %c0_147 = arith.constant 0 : index
    %268 = vector.load %arg20[%c1_145, %c0_146, %c0_147] : memref<2x64x32xf32, #tpu.memory_space<vmem>>, vector<1x64x32xf32>
    %269 = vector.shape_cast %268 : vector<1x64x32xf32> to vector<64x32xf32>
    %cst_148 = arith.constant dense<0.000000e+00> : vector<7x32xf32>
    %270 = tpu.matmul %267, %269, %cst_148 {dimension_numbers = #tpu.dot_dimension_numbers<[1], [0], [0], [1], [0, 0, 1, 1], [], []>} : vector<7x64xf32>, vector<64x32xf32>, vector<7x32xf32> -> vector<7x32xf32>
    %c1_149 = arith.constant 1 : index
    %c0_150 = arith.constant 0 : index
    %c0_151 = arith.constant 0 : index
    %271 = vector.load %arg21[%c1_149, %c0_150, %c0_151] : memref<2x1x32xf32, #tpu.memory_space<vmem>>, vector<1x1x32xf32>
    %272 = vector.shape_cast %271 : vector<1x1x32xf32> to vector<1x32xf32>
    %273 = vector.broadcast %272 : vector<1x32xf32> to vector<7x32xf32>
    %274 = arith.addf %270, %273 : vector<7x32xf32>
    %275 = arith.addf %274, %226 : vector<7x32xf32>
    %276 = vector.extract_strided_slice %275 {offsets = [5, 0], sizes = [1, 32], strides = [1, 1]} : vector<7x32xf32> to vector<1x32xf32>
    %277 = vector.extract_strided_slice %275 {offsets = [6, 0], sizes = [1, 32], strides = [1, 1]} : vector<7x32xf32> to vector<1x32xf32>
    %278 = vector.extract_strided_slice %275 {offsets = [4, 0], sizes = [1, 32], strides = [1, 1]} : vector<7x32xf32> to vector<1x32xf32>
    %279 = tpu.concatenate %276, %277, %278 in 1 : vector<1x32xf32>, vector<1x32xf32>, vector<1x32xf32> -> vector<1x96xf32>
    %c0_152 = arith.constant 0 : index
    %c0_153 = arith.constant 0 : index
    %280 = vector.load %arg22[%c0_152, %c0_153] : memref<1x96xf32, #tpu.memory_space<vmem>>, vector<1x96xf32>
    %c0_154 = arith.constant 0 : index
    %c0_155 = arith.constant 0 : index
    %281 = vector.load %arg23[%c0_154, %c0_155] : memref<1x96xf32, #tpu.memory_space<vmem>>, vector<1x96xf32>
    %cst_156 = arith.constant dense<0.000000e+00> : vector<1xf32>
    %282 = vector.multi_reduction <add>, %279, %cst_156 [1] : vector<1x96xf32> to vector<1xf32>
    %283 = vector.shape_cast %282 : vector<1xf32> to vector<1x1xf32>
    %cst_157 = arith.constant 9.600000e+01 : f32
    %284 = vector.broadcast %cst_157 : f32 to vector<1x1xf32>
    %285 = arith.divf %283, %284 : vector<1x1xf32>
    %286 = vector.broadcast %285 : vector<1x1xf32> to vector<1x96xf32>
    %287 = arith.subf %279, %286 : vector<1x96xf32>
    %288 = arith.mulf %287, %287 : vector<1x96xf32>
    %cst_158 = arith.constant dense<0.000000e+00> : vector<1xf32>
    %289 = vector.multi_reduction <add>, %288, %cst_158 [1] : vector<1x96xf32> to vector<1xf32>
    %290 = vector.shape_cast %289 : vector<1xf32> to vector<1x1xf32>
    %cst_159 = arith.constant 9.600000e+01 : f32
    %291 = vector.broadcast %cst_159 : f32 to vector<1x1xf32>
    %292 = arith.divf %290, %291 : vector<1x1xf32>
    %293 = vector.broadcast %285 : vector<1x1xf32> to vector<1x96xf32>
    %294 = arith.subf %279, %293 : vector<1x96xf32>
    %cst_160 = arith.constant 9.99999974E-6 : f32
    %295 = vector.broadcast %cst_160 : f32 to vector<1x1xf32>
    %296 = arith.addf %292, %295 : vector<1x1xf32>
    %297 = math.rsqrt %296 : vector<1x1xf32>
    %298 = vector.broadcast %297 : vector<1x1xf32> to vector<1x96xf32>
    %299 = arith.mulf %294, %298 : vector<1x96xf32>
    %300 = arith.mulf %299, %280 : vector<1x96xf32>
    %301 = arith.addf %300, %281 : vector<1x96xf32>
    %c0_161 = arith.constant 0 : index
    %c0_162 = arith.constant 0 : index
    %302 = vector.load %arg24[%c0_161, %c0_162] : memref<96x128xf32, #tpu.memory_space<vmem>>, vector<96x128xf32>
    %cst_163 = arith.constant dense<0.000000e+00> : vector<1x128xf32>
    %303 = tpu.matmul %301, %302, %cst_163 {dimension_numbers = #tpu.dot_dimension_numbers<[1], [0], [0], [1], [0, 0, 1, 1], [], []>} : vector<1x96xf32>, vector<96x128xf32>, vector<1x128xf32> -> vector<1x128xf32>
    %c0_164 = arith.constant 0 : index
    %c0_165 = arith.constant 0 : index
    %304 = vector.load %arg25[%c0_164, %c0_165] : memref<1x128xf32, #tpu.memory_space<vmem>>, vector<1x128xf32>
    %305 = arith.addf %303, %304 : vector<1x128xf32>
    %c0_166 = arith.constant 0 : index
    %c0_167 = arith.constant 0 : index
    %306 = vector.load %arg26[%c0_166, %c0_167] : memref<128x10xf32, #tpu.memory_space<vmem>>, vector<128x10xf32>
    %cst_168 = arith.constant dense<0.000000e+00> : vector<1x10xf32>
    %307 = tpu.matmul %305, %306, %cst_168 {dimension_numbers = #tpu.dot_dimension_numbers<[1], [0], [0], [1], [0, 0, 1, 1], [], []>} : vector<1x128xf32>, vector<128x10xf32>, vector<1x10xf32> -> vector<1x10xf32>
    %c0_169 = arith.constant 0 : index
    %c0_170 = arith.constant 0 : index
    %308 = vector.load %arg27[%c0_169, %c0_170] : memref<1x10xf32, #tpu.memory_space<vmem>>, vector<1x10xf32>
    %309 = arith.addf %307, %308 : vector<1x10xf32>
    %c0_171 = arith.constant 0 : index
    %c0_172 = arith.constant 0 : index
    %c0_173 = arith.constant 0 : index
    %310 = vector.load %arg28[%c0_171, %c0_172, %c0_173] : memref<1x1x10xf32, #tpu.memory_space<vmem>>, vector<1x1x10xf32>
    %311 = vector.shape_cast %310 : vector<1x1x10xf32> to vector<1x10xf32>
    %312 = vector.shape_cast %309 : vector<1x10xf32> to vector<1x1x10xf32>
    tpu.vector_store %arg28[%c0_171, %c0_172, %c0_173], %312 {strides = array<i32>} : memref<1x1x10xf32, #tpu.memory_space<vmem>>, vector<1x1x10xf32>,
    return
  }
  func.func @transform_0(%arg0: i32) -> (i32, i32, i32) {
    %c0_i32 = arith.constant 0 : i32
    %c0_i32_0 = arith.constant 0 : i32
    %c0_i32_1 = arith.constant 0 : i32
    return %arg0, %c0_i32, %c0_i32_0 : i32, i32, i32
  }
  func.func @transform_1(%arg0: i32) -> (i32, i32, i32) {
    %c0_i32 = arith.constant 0 : i32
    %c0_i32_0 = arith.constant 0 : i32
    %c0_i32_1 = arith.constant 0 : i32
    return %arg0, %c0_i32, %c0_i32_0 : i32, i32, i32
  }
  func.func @transform_2(%arg0: i32) -> (i32, i32) {
    %c0_i32 = arith.constant 0 : i32
    %c0_i32_0 = arith.constant 0 : i32
    %c0_i32_1 = arith.constant 0 : i32
    return %c0_i32, %c0_i32_0 : i32, i32
  }
  func.func @transform_3(%arg0: i32) -> (i32, i32) {
    %c0_i32 = arith.constant 0 : i32
    %c0_i32_0 = arith.constant 0 : i32
    %c0_i32_1 = arith.constant 0 : i32
    return %c0_i32, %c0_i32_0 : i32, i32
  }
  func.func @transform_4(%arg0: i32) -> (i32, i32) {
    %c0_i32 = arith.constant 0 : i32
    %c0_i32_0 = arith.constant 0 : i32
    %c0_i32_1 = arith.constant 0 : i32
    return %c0_i32, %c0_i32_0 : i32, i32
  }
  func.func @transform_5(%arg0: i32) -> (i32, i32) {
    %c0_i32 = arith.constant 0 : i32
    %c0_i32_0 = arith.constant 0 : i32
    %c0_i32_1 = arith.constant 0 : i32
    return %c0_i32, %c0_i32_0 : i32, i32
  }
  func.func @transform_6(%arg0: i32) -> (i32, i32) {
    %c0_i32 = arith.constant 0 : i32
    %c0_i32_0 = arith.constant 0 : i32
    %c0_i32_1 = arith.constant 0 : i32
    return %c0_i32, %c0_i32_0 : i32, i32
  }
  func.func @transform_7(%arg0: i32) -> (i32, i32) {
    %c0_i32 = arith.constant 0 : i32
    %c0_i32_0 = arith.constant 0 : i32
    %c0_i32_1 = arith.constant 0 : i32
    return %c0_i32, %c0_i32_0 : i32, i32
  }
  func.func @transform_8(%arg0: i32) -> (i32, i32) {
    %c0_i32 = arith.constant 0 : i32
    %c0_i32_0 = arith.constant 0 : i32
    %c0_i32_1 = arith.constant 0 : i32
    return %c0_i32, %c0_i32_0 : i32, i32
  }
  func.func @transform_9(%arg0: i32) -> (i32, i32) {
    %c0_i32 = arith.constant 0 : i32
    %c0_i32_0 = arith.constant 0 : i32
    %c0_i32_1 = arith.constant 0 : i32
    return %c0_i32, %c0_i32_0 : i32, i32
  }
  func.func @transform_10(%arg0: i32) -> (i32, i32, i32) {
    %c0_i32 = arith.constant 0 : i32
    %c0_i32_0 = arith.constant 0 : i32
    %c0_i32_1 = arith.constant 0 : i32
    %c0_i32_2 = arith.constant 0 : i32
    return %c0_i32, %c0_i32_0, %c0_i32_1 : i32, i32, i32
  }
  func.func @transform_11(%arg0: i32) -> (i32, i32, i32) {
    %c0_i32 = arith.constant 0 : i32
    %c0_i32_0 = arith.constant 0 : i32
    %c0_i32_1 = arith.constant 0 : i32
    %c0_i32_2 = arith.constant 0 : i32
    return %c0_i32, %c0_i32_0, %c0_i32_1 : i32, i32, i32
  }
  func.func @transform_12(%arg0: i32) -> (i32, i32, i32, i32) {
    %c0_i32 = arith.constant 0 : i32
    %c0_i32_0 = arith.constant 0 : i32
    %c0_i32_1 = arith.constant 0 : i32
    %c0_i32_2 = arith.constant 0 : i32
    %c0_i32_3 = arith.constant 0 : i32
    return %c0_i32, %c0_i32_0, %c0_i32_1, %c0_i32_2 : i32, i32, i32, i32
  }
  func.func @transform_13(%arg0: i32) -> (i32, i32, i32, i32) {
    %c0_i32 = arith.constant 0 : i32
    %c0_i32_0 = arith.constant 0 : i32
    %c0_i32_1 = arith.constant 0 : i32
    %c0_i32_2 = arith.constant 0 : i32
    %c0_i32_3 = arith.constant 0 : i32
    return %c0_i32, %c0_i32_0, %c0_i32_1, %c0_i32_2 : i32, i32, i32, i32
  }
  func.func @transform_14(%arg0: i32) -> (i32, i32, i32) {
    %c0_i32 = arith.constant 0 : i32
    %c0_i32_0 = arith.constant 0 : i32
    %c0_i32_1 = arith.constant 0 : i32
    %c0_i32_2 = arith.constant 0 : i32
    return %c0_i32, %c0_i32_0, %c0_i32_1 : i32, i32, i32
  }
  func.func @transform_15(%arg0: i32) -> (i32, i32, i32) {
    %c0_i32 = arith.constant 0 : i32
    %c0_i32_0 = arith.constant 0 : i32
    %c0_i32_1 = arith.constant 0 : i32
    %c0_i32_2 = arith.constant 0 : i32
    return %c0_i32, %c0_i32_0, %c0_i32_1 : i32, i32, i32
  }
  func.func @transform_16(%arg0: i32) -> (i32, i32, i32) {
    %c0_i32 = arith.constant 0 : i32
    %c0_i32_0 = arith.constant 0 : i32
    %c0_i32_1 = arith.constant 0 : i32
    %c0_i32_2 = arith.constant 0 : i32
    return %c0_i32, %c0_i32_0, %c0_i32_1 : i32, i32, i32
  }
  func.func @transform_17(%arg0: i32) -> (i32, i32, i32) {
    %c0_i32 = arith.constant 0 : i32
    %c0_i32_0 = arith.constant 0 : i32
    %c0_i32_1 = arith.constant 0 : i32
    %c0_i32_2 = arith.constant 0 : i32
    return %c0_i32, %c0_i32_0, %c0_i32_1 : i32, i32, i32
  }
  func.func @transform_18(%arg0: i32) -> (i32, i32, i32) {
    %c0_i32 = arith.constant 0 : i32
    %c0_i32_0 = arith.constant 0 : i32
    %c0_i32_1 = arith.constant 0 : i32
    %c0_i32_2 = arith.constant 0 : i32
    return %c0_i32, %c0_i32_0, %c0_i32_1 : i32, i32, i32
  }
  func.func @transform_19(%arg0: i32) -> (i32, i32, i32) {
    %c0_i32 = arith.constant 0 : i32
    %c0_i32_0 = arith.constant 0 : i32
    %c0_i32_1 = arith.constant 0 : i32
    %c0_i32_2 = arith.constant 0 : i32
    return %c0_i32, %c0_i32_0, %c0_i32_1 : i32, i32, i32
  }
  func.func @transform_20(%arg0: i32) -> (i32, i32, i32) {
    %c0_i32 = arith.constant 0 : i32
    %c0_i32_0 = arith.constant 0 : i32
    %c0_i32_1 = arith.constant 0 : i32
    %c0_i32_2 = arith.constant 0 : i32
    return %c0_i32, %c0_i32_0, %c0_i32_1 : i32, i32, i32
  }
  func.func @transform_21(%arg0: i32) -> (i32, i32) {
    %c0_i32 = arith.constant 0 : i32
    %c0_i32_0 = arith.constant 0 : i32
    %c0_i32_1 = arith.constant 0 : i32
    return %c0_i32, %c0_i32_0 : i32, i32
  }
  func.func @transform_22(%arg0: i32) -> (i32, i32) {
    %c0_i32 = arith.constant 0 : i32
    %c0_i32_0 = arith.constant 0 : i32
    %c0_i32_1 = arith.constant 0 : i32
    return %c0_i32, %c0_i32_0 : i32, i32
  }
  func.func @transform_23(%arg0: i32) -> (i32, i32) {
    %c0_i32 = arith.constant 0 : i32
    %c0_i32_0 = arith.constant 0 : i32
    %c0_i32_1 = arith.constant 0 : i32
    return %c0_i32, %c0_i32_0 : i32, i32
  }
  func.func @transform_24(%arg0: i32) -> (i32, i32) {
    %c0_i32 = arith.constant 0 : i32
    %c0_i32_0 = arith.constant 0 : i32
    %c0_i32_1 = arith.constant 0 : i32
    return %c0_i32, %c0_i32_0 : i32, i32
  }
  func.func @transform_25(%arg0: i32) -> (i32, i32) {
    %c0_i32 = arith.constant 0 : i32
    %c0_i32_0 = arith.constant 0 : i32
    %c0_i32_1 = arith.constant 0 : i32
    return %c0_i32, %c0_i32_0 : i32, i32
  }
  func.func @transform_26(%arg0: i32) -> (i32, i32) {
    %c0_i32 = arith.constant 0 : i32
    %c0_i32_0 = arith.constant 0 : i32
    %c0_i32_1 = arith.constant 0 : i32
    return %c0_i32, %c0_i32_0 : i32, i32
  }
  func.func @transform_27(%arg0: i32) -> (i32, i32, i32) {
    %c0_i32 = arith.constant 0 : i32
    %c0_i32_0 = arith.constant 0 : i32
    %c0_i32_1 = arith.constant 0 : i32
    return %arg0, %c0_i32, %c0_i32_0 : i32, i32, i32
  }
}

</mosaic_0001>

<bundles_post_ra>
// kernel: vit_v2_forward.1
= control target key start
LH: loop header
LB: loop body
LE: loop exit
PB: predicated region body
PF: predicated region fallthrough
CT: control target
= control target key end

     0   :  { %s5638_s0 = inlined_call_operand.vmem [shape: f32[2,4,256], index: 0, kind: input, shape index: {}]   ;;  %s5639_s1 = inlined_call_operand.vmem [shape: f32[2,1,32], index: 1, kind: input, shape index: {}]   ;;  %s5640_s2 = inlined_call_operand.vmem [shape: f32[1,256], index: 2, kind: input, shape index: {}]   ;;  %s5641_s3 = inlined_call_operand.vmem [shape: f32[1,256], index: 3, kind: input, shape index: {}]   ;;  %s5642_s4 = inlined_call_operand.vmem [shape: f32[256,32], index: 4, kind: input, shape index: {}]   ;;  %s5643_s5 = inlined_call_operand.vmem [shape: f32[1,32], index: 5, kind: input, shape index: {}]   ;;  %s5644_s6 = inlined_call_operand.vmem [shape: f32[1,32], index: 6, kind: input, shape index: {}]   ;;  %s5645_s7 = inlined_call_operand.vmem [shape: f32[1,32], index: 7, kind: input, shape index: {}]   ;;  %s5646_s8 = inlined_call_operand.vmem [shape: f32[7,32], index: 8, kind: input, shape index: {}]   ;;  %s5647_s9 = inlined_call_operand.vmem [shape: f32[2,32], index: 9, kind: input, shape index: {}]   ;;  %s5648_s10 = inlined_call_operand.vmem [shape: f32[2,1,32], index: 10, kind: input, shape index: {}]   ;;  %s5649_s11 = inlined_call_operand.vmem [shape: f32[2,1,32], index: 11, kind: input, shape index: {}]   ;;  %s5650_s12 = inlined_call_operand.vmem [shape: f32[2,6,32,16], index: 12, kind: input, shape index: {}]   ;;  %s5651_s13 = inlined_call_operand.vmem [shape: f32[2,2,16,32], index: 13, kind: input, shape index: {}]   ;;  %s5652_s14 = inlined_call_operand.vmem [shape: f32[2,1,32], index: 14, kind: input, shape index: {}]   ;;  %s5653_s15 = inlined_call_operand.vmem [shape: f32[2,1,32], index: 15, kind: input, shape index: {}]   ;;  %s5654_s16 = inlined_call_operand.vmem [shape: f32[2,1,32], index: 16, kind: input, shape index: {}]   ;;  %s5655_s17 = inlined_call_operand.vmem [shape: f32[2,32,64], index: 17, kind: input, shape index: {}]   ;;  %s5656_s18 = inlined_call_operand.vmem [shape: f32[2,1,64], index: 18, kind: input, shape index: {}]   ;;  %s5657_s19 = inlined_call_operand.vmem [shape: f32[2,64,32], index: 19, kind: input, shape index: {}]   ;;  %s5658_s20 = inlined_call_operand.vmem [shape: f32[2,1,32], index: 20, kind: input, shape index: {}]   ;;  %s5659_s21 = inlined_call_operand.vmem [shape: f32[1,96], index: 21, kind: input, shape index: {}]   ;;  %s5660_s22 = inlined_call_operand.vmem [shape: f32[1,96], index: 22, kind: input, shape index: {}]   ;;  %s5661_s23 = inlined_call_operand.vmem [shape: f32[96,128], index: 23, kind: input, shape index: {}]   ;;  %s5662_s24 = inlined_call_operand.vmem [shape: f32[1,128], index: 24, kind: input, shape index: {}]   ;;  %s5663_s25 = inlined_call_operand.vmem [shape: f32[128,10], index: 25, kind: input, shape index: {}]   ;;  %s5664_s26 = inlined_call_operand.vmem [shape: f32[1,10], index: 26, kind: input, shape index: {}]   ;;  %s5665_s27 = inlined_call_operand.hbm [shape: f32[2,1,10], index: 27, kind: output, shape index: {}]  }
   0x1   :  { %5677 = sst [smem:[#allocation12_spill]] %s5638_s0 }
   0x2   :  { %5678 = sst [smem:[#allocation13_spill]] %s5639_s1 }
   0x3   :  { %5679 = sst [smem:[#allocation14_spill]] %s5640_s2 }
   0x4   :  { %5680 = sst [smem:[#allocation15_spill]] %s5641_s3 }
   0x5   :  { %5681 = sst [smem:[#allocation16_spill]] %s5642_s4 }
   0x6   :  { %5682 = sst [smem:[#allocation17_spill]] %s5643_s5 }
   0x7   :  { %5683 = sst [smem:[#allocation18_spill]] %s5644_s6 }
   0x8   :  { %5684 = sst [smem:[#allocation19_spill]] %s5645_s7 }
   0x9   :  { %5685 = sst [smem:[#allocation20_spill]] %s5646_s8 }
   0xa   :  { %5686 = sst [smem:[#allocation21_spill]] %s5647_s9 }
   0xb   :  { %5687 = sst [smem:[#allocation22_spill]] %s5648_s10 }
   0xc   :  { %5688 = sst [smem:[#allocation23_spill]] %s5649_s11 }
   0xd   :  { %5689 = sst [smem:[#allocation24_spill]] %s5650_s12 }
   0xe   :  { %5690 = sst [smem:[#allocation25_spill]] %s5665_s27 }
   0xf   :  { %32 = vsyncpa [#allocation4], 0 }
  0x10   :  { %34 = vsyncpa [#allocation4 + $0x1], 0  ;;  %s4814_s7 = smov 0   ;;  %s4816_s4 = smov 0  }
  0x11   :  { %s4818_s8 = smov 0   ;;  %s4820_s30 = smov 0  }
  0x12 LB: > { %5691 = sst [smem:[#allocation6_spill]] %s4653_s7  ;;  %s4835_s9 = sadd.s32 4294967295, %s4665_s30   ;;  %s4665_s30 = sphi %s4820_s30, %s5717_s30   ;;  %s4661_s8 = sphi %s4818_s8, %s5719_s8   ;;  %s4657_s4 = sphi %s4816_s4, %s5721_s4   ;;  %s4653_s7 = sphi %s4814_s7, %s5720_s7  }
  0x13   : > { %5692 = sst [smem:[#allocation7_spill]] %s4661_s8  ;;  %s3713_s5 = sadd.s32 4294967294, %s4665_s30  }
  0x14   : > { %5693 = sst [smem:[#allocation8_spill]] %s4665_s30  ;;  %s4839_s28 = sadd.s32 1, %s4665_s30  }
  0x15   : > { %5694 = sst [smem:[#allocation9_spill]] %s4839_s28  ;;  %s624_s0 = sadd.s32 1, %s4661_s8 }
  0x16   : > { %s621_s10 = ssub.s32 %s4665_s30, %s4839_s28  ;;  %p634_p0 = scmp.ne.s32.totalorder %s4661_s8, %s4657_s4 }
  0x17   : > { %p622_p1 = scmp.eq.s32.totalorder %s621_s10, 0  ;;  %p635_p2 = scmp.eq.s32.totalorder %s4835_s9, 1 }
  0x18   : > { %p640_p3 = scmp.ne.s32.totalorder %s4657_s4, %s4653_s7  ;;  %p641_p4 = scmp.eq.s32.totalorder %s3713_s5, 1 }
  0x19   : > { %s4850_s29 = scalar_select %p622_p1, %s4661_s8, %s624_s0  }
  0x1a   : > { %p4852_p5 = por %p635_p2, %p634_p0  ;;  %p4856_p6 = por %p641_p4, %p640_p3 }
  0x1b   : > { %5695 = sst [smem:[#allocation10_spill]] %s4850_s29  ;;  %p3716_p7 = scmp.ge.s32.totalorder %s4665_s30, 1 }
  0x1c   : > { %s5697_s6 = scalar_select %p4856_p6, 1, 0 }
  0x1d   : > { %p748_p8 = scmp.lt.s32.totalorder %s4665_s30, 3 }
  0x1e   : > { %5698 = sst [smem:[#allocation11_spill]] %s5697_s6 }
  0x1f   : > { %p749_p9 = pnand %p3716_p7, %p748_p8 }
  0x20   : > { %p822_p10 = scmp.lt.s32.totalorder (!%p749_p9), %s4835_s9, 1  ;;  %vm1045_vm0 = vcmask (!%p749_p9), 253952   ;;  %s5699_s0 = sld [smem:[#allocation13_spill]] (!%p749_p9)  ;;  %vm836_vm1 = vcmask (!%p749_p9), 1043456   ;;  %v4667_v18 = vmov (!%p749_p9), 839922192   ;;  %v848_v20 = vlaneseq (!%p749_p9) }
  0x21   : > { %752 = sbr.rel (%p749_p9) target bundleno = 6311 (0x18a7), region = 128  ;;  %s5700_s28 = sld [smem:[#allocation12_spill]] (!%p749_p9)  ;;  %v846_v19 = vunpack.c.l.s4 (!%p749_p9), %v4667_v18  ;;  %vm1014_vm2 = vcmask (!%p749_p9), 257024   ;;  %vm1048_vm3 = vcmask (!%p749_p9), 254976   ;;  %vm1055_vm4 = vcmask (!%p749_p9), 260096  }
  0x22   : > { %s5701_s27 = sld [smem:[#allocation16_spill]] (!%p749_p9)  ;;  %v4896_v22 = vshrl.u32 (!%p749_p9), %v848_v20, 7  ;;  %s5703_s5 = sld [smem:[#allocation15_spill]] (!%p749_p9)  ;;  %vm4669_vm5 = vmmov (!%p749_p9), 0   ;;  %vm1107_vm6 = vcmask (!%p749_p9), 261120   ;;  %vm1533_vm7 = vcmask (!%p749_p9), 130048  }
  0x23   : > { %v847_v21 = vunpack.c.0.s8 (!%p749_p9), %v846_v19  ;;  %s5704_s6 = sld [smem:[#allocation17_spill]] (!%p749_p9)  ;;  %s5705_s3 = sld [smem:[#allocation21_spill]] (!%p749_p9)  ;;  %vm1713_vm8 = vcmask (!%p749_p9), 1046528   ;;  %vm1686_vm9 = vcmask (!%p749_p9), 55296   ;;  %vm1709_vm10 = vcmask (!%p749_p9), 56320  }
  0x24   : > { %s5709_s12 = sld [smem:[#allocation24_spill]] (!%p749_p9)  ;;  %s5710_s29 = sld [smem:[#allocation22_spill]] (!%p749_p9)  ;;  %vm2158_vm11 = vcmask (!%p749_p9), 523264   ;;  %vm3430_vm12 = vcmask (!%p749_p9), 783365   ;;  %vm3474_vm13 = vcmask (!%p749_p9), 785408   ;;  %vm3634_vm14 = vcmask (!%p749_p9), 73728  }
  0x25   : > { %v4899_v23 = vsub.s32 (!%p749_p9), %v847_v21, %v4896_v22 }
  0x28   : > { %s823_s11 = scalar_select %p822_p10, %s4835_s9, 1  ;;  %v916_v6 = vld [vmem:[%s5701_s27 + $0x80] sm:$0xff]  ;;  %v917_v7 = vld [vmem:[%s5701_s27 + $0x88] sm:$0xff]  ;;  %v918_v11 = vld [vmem:[%s5701_s27 + $0x90] sm:$0xff] }
  0x29   : > { %v900_v8 = vld [vmem:[%s5701_s27] sm:$0xff]  ;;  %v4329_v9 = vpack.c.bf16 %v917_v7, %v916_v6  ;;  %v901_v10 = vld [vmem:[%s5701_s27 + $0x8] sm:$0xff]  ;;  %v919_v12 = vld [vmem:[%s5701_s27 + $0x98] sm:$0xff] }
  0x2a   : > { %s3825_s2 = sshll.u32 %s823_s11, 3  ;;  %s829_s10 = scalar_lea.vmem %s5699_s0, %s823_s11  ;;  %v4331_v13 = vpack.c.bf16 %v901_v10, %v900_v8  ;;  %v4333_v14 = vpack.c.bf16 %v919_v12, %v918_v11  ;;  %v902_v15 = vld [vmem:[%s5701_s27 + $0x10] sm:$0xff]  ;;  %v903_v16 = vld [vmem:[%s5701_s27 + $0x18] sm:$0xff]  ;;  %v920_v33 = vld [vmem:[%s5701_s27 + $0xa0] sm:$0xff]  ;;  %v879_v8 = vsub.s32 0, %v4896_v22 }
  0x2b   : > { %s826_s7 = scalar_lea.vmem %s5700_s28, %s3825_s2  ;;  %v1044_v0 = vld [vmem:[%s829_s10] sm:$0x1]  ;;  %4330 = vmatprep.subr.bf16.mxu0 %v4329_v9  ;;  %v4335_v17 = vpack.c.bf16 %v903_v16, %v902_v15  ;;  %v921_v34 = vld [vmem:[%s5701_s27 + $0xa8] sm:$0xff]  ;;  %v922_v39 = vld [vmem:[%s5701_s27 + $0xb0] sm:$0xff]  ;;  %v883_v9 = vsub.s32 1, %v4896_v22  ;;  %s4671_s11 = smov 64  }
  0x2c   : > { %v830_v1 = vld [vmem:[%s826_s7] sm:$0xff]  ;;  %1046 = vst.msk [vmem:[#allocation2 + $0x4] sm:$0x1] %vm1045_vm0, %v1044_v0  ;;  %4332 = vmatpush3.bf16.msra.mxu0 %v4331_v13  ;;  %v4337_v35 = vpack.c.bf16 %v921_v34, %v920_v33  ;;  %v905_v37 = vld [vmem:[%s5701_s27 + $0x28] sm:$0xff]  ;;  %v923_v40 = vld [vmem:[%s5701_s27 + $0xb8] sm:$0xff]  ;;  %s5702_s7 = sld [smem:[#allocation14_spill]] }
  0x2d   : > { %v834_v2 = vcombine.high %v830_v1, %v830_v1  ;;  %v837_v3 = vsel %vm836_vm1, %v830_v1, 0.0  ;;  %4334 = vmatprep.subr.bf16.mxu0 %v4333_v14  ;;  %v904_v36 = vld [vmem:[%s5701_s27 + $0x20] sm:$0xff]  ;;  %v4341_v41 = vpack.c.bf16 %v923_v40, %v922_v39  ;;  %v906_v42 = vld [vmem:[%s5701_s27 + $0x30] sm:$0xff]  ;;  %v907_v43 = vld [vmem:[%s5701_s27 + $0x38] sm:$0xff] }
  0x2e   : > { %v4339_v38 = vpack.c.bf16 %v905_v37, %v904_v36  ;;  %v924_v44 = vld [vmem:[%s5701_s27 + $0xc0] sm:$0xff]  ;;  %v4343_v45 = vpack.c.bf16 %v907_v43, %v906_v42  ;;  %v925_v46 = vld [vmem:[%s5701_s27 + $0xc8] sm:$0xff]  ;;  %v926_v50 = vld [vmem:[%s5701_s27 + $0xd0] sm:$0xff] }
  0x2f   : > { %v838_v4 = vsel %vm836_vm1, %v834_v2, 0.0  ;;  %v908_v47 = vld [vmem:[%s5701_s27 + $0x40] sm:$0xff]  ;;  %v909_v48 = vld [vmem:[%s5701_s27 + $0x48] sm:$0xff]  ;;  %v4345_v49 = vpack.c.bf16 %v925_v46, %v924_v44  ;;  %v927_v51 = vld [vmem:[%s5701_s27 + $0xd8] sm:$0xff] }
  0x30   : > { %v839_v5 = vadd.f32 %v838_v4, %v837_v3  ;;  %4336 = vmatpush3.bf16.msra.mxu0 %v4335_v17  ;;  %v4347_v52 = vpack.c.bf16 %v909_v48, %v908_v47  ;;  %v4349_v53 = vpack.c.bf16 %v927_v51, %v926_v50  ;;  %v910_v54 = vld [vmem:[%s5701_s27 + $0x50] sm:$0xff]  ;;  %v911_v55 = vld [vmem:[%s5701_s27 + $0x58] sm:$0xff]  ;;  %v928_v56 = vld [vmem:[%s5701_s27 + $0xe0] sm:$0xff] }
  0x31   : > { %4338 = vmatprep.subr.bf16.mxu0 %v4337_v35  ;;  %v929_v57 = vld [vmem:[%s5701_s27 + $0xe8] sm:$0xff]  ;;  %v4351_v58 = vpack.c.bf16 %v911_v55, %v910_v54  ;;  %v912_v60 = vld [vmem:[%s5701_s27 + $0x60] sm:$0xff]  ;;  %v930_v62 = vld [vmem:[%s5701_s27 + $0xf0] sm:$0xff] }
  0x32   : > { %840 = vadd.xlane.f32.xlu0 %v839_v5  ;;  %v4353_v59 = vpack.c.bf16 %v929_v57, %v928_v56  ;;  %v913_v61 = vld [vmem:[%s5701_s27 + $0x68] sm:$0xff]  ;;  %v931_v63 = vld [vmem:[%s5701_s27 + $0xf8] sm:$0xff]  ;;  %v914_v2 = vld [vmem:[%s5701_s27 + $0x70] sm:$0xff] }
  0x33   : > { %v4355_v0 = vpack.c.bf16 %v913_v61, %v912_v60  ;;  %v915_v3 = vld [vmem:[%s5701_s27 + $0x78] sm:$0xff]  ;;  %v831_v10 = vld [vmem:[%s5702_s7] sm:$0x3]  ;;  %s5706_s7 = sld [smem:[#allocation18_spill]]  ;;  %v1084_v55 = vld [vmem:[%s5709_s12 + $0x8] sm:$0xff] }
  0x34   : > { %4340 = vmatpush3.bf16.msra.mxu0 %v4339_v38  ;;  %v4359_v4 = vpack.c.bf16 %v915_v3, %v914_v2  ;;  %v832_v11 = vld [vmem:[%s5703_s5] sm:$0x3]  ;;  %v880_v12 = vrot.slane %v831_v10, %v879_v8  ;;  %v884_v13 = vrot.slane %v831_v10, %v883_v9  ;;  %s5707_s5 = sld [smem:[#allocation19_spill]]  ;;  %v1085_v61 = vld [vmem:[%s5709_s12 + $0x10] sm:$0xff]  ;;  %v4670_v3 = vmov 0.0  }
  0x35   : > { %4342 = vmatprep.subr.bf16.mxu0 %v4341_v41  ;;  %v892_v14 = vrot.slane %v832_v11, %v879_v8  ;;  %v896_v15 = vrot.slane %v832_v11, %v883_v9  ;;  %v1047_v35 = vld [vmem:[%s5705_s3] sm:$0x3]  ;;  %4026 = vmatprep.mubr.msk.f32.mxu1 %vm4669_vm5, %v4670_v3  ;;  %v1092_v11 = vld [vmem:[%s5709_s12 + $0x48] sm:$0xff]  ;;  %s4672_s3 = smov 32  }
  0x36   : > { %v885_v18 = vcombine.low %v880_v12, %v884_v13  ;;  %1049 = vst.msk [vmem:[#allocation2 + $0x5] sm:$0x3] %vm1048_vm3, %v1047_v35  ;;  %v1083_v54 = vld [vmem:[%s5709_s12] sm:$0xff]  ;;  %v1100_v13 = vld [vmem:[%s5709_s12 + $0x88] sm:$0xff]  ;;  %v1106_v35 = vld [vmem:[%s5709_s12 + $0xb8] sm:$0xff] }
  0x37   : > { %v897_v20 = vcombine.low %v892_v14, %v896_v15  ;;  %v1087_v56 = vld [vmem:[%s5709_s12 + $0x20] sm:$0xff]  ;;  %v4362_v57 = vpack.c.bf16 %v1084_v55, %v1083_v54 }
  0x38   : > { %4344 = vmatpush3.bf16.msra.mxu0 %v4343_v45  ;;  %v3722_v8 = vld [vmem:[%s5710_s29] ss:$0 sm:$0xff] }
  0x39   : > { %4346 = vmatprep.subr.bf16.mxu0 %v4345_v49  ;;  %v3720_v40 = vld [vmem:[%s5706_s7] ss:$0 sm:$0xff]  ;;  %s5711_s7 = sld [smem:[#allocation23_spill]] }
  0x3a   : > { %v3721_v42 = vld [vmem:[%s5707_s5] ss:$0 sm:$0xff]  ;;  %s5713_s5 = sld [smem:[#allocation25_spill]] }
  0x3b   : > { %v1091_v9 = vld [vmem:[%s5709_s12 + $0x40] sm:$0xff] }
  0x3c   : > { %4348 = vmatpush3.bf16.msra.mxu0 %v4347_v52  ;;  %v1099_v12 = vld [vmem:[%s5709_s12 + $0x80] sm:$0xff] }
  0x3d   : > { %4350 = vmatprep.subr.bf16.mxu0 %v4349_v53 }
  0x3f   : > { %s5712_s27 = smov %s5711_s7  ;;  %v3723_v14 = vld [vmem:[%s5711_s7] ss:$0 sm:$0xff] }
  0x40   : > { %4352 = vmatpush3.bf16.msra.mxu0 %v4351_v58  ;;  %v1088_v58 = vld [vmem:[%s5709_s12 + $0x28] sm:$0xff] }
  0x41   : > { %4354 = vmatprep.subr.bf16.mxu0 %v4353_v59  ;;  %v4668_v59 = vmov 0.0|0.0   ;;  %v4368_v60 = vpack.c.bf16 %v1088_v58, %v1087_v56 }
  0x42   : > { %4367 = vmatprep.subr.bf16.mxu1 %v4668_v59 }
  0x43   : > { %4369 = vmatpush3.bf16.msra.mxu1 %v4368_v60 }
  0x44   : > { %4356 = vmatpush3.bf16.msra.mxu0 %v4355_v0  ;;  %4370 = vmatprep.subr.bf16.mxu1 %v4668_v59 }
  0xbf   : > { %v841_v24 = vpop.xlane.xlu0 %840 }
  0xc0   : > { %v843_v25 = vmul.f32 0.00390625, %v841_v24 }
  0xc2   : > { %v851_v26 = vrot.slane %v843_v25, %v4899_v23 }
  0xc4   : > { %v4902_v27 = vsub.f32 %v830_v1, %v851_v26  ;;  %v4357_v1 = vpack.c.bf16 %v931_v63, %v930_v62  ;;  %v1086_v62 = vld [vmem:[%s5709_s12 + $0x18] sm:$0xff]  ;;  %v1089_v63 = vld [vmem:[%s5709_s12 + $0x30] sm:$0xff] }
  0xc5   : > { %v4365_v0 = vpack.c.bf16 %v1086_v62, %v1085_v61 }
  0xc6   : > { %v854_v28 = vmul.f32 %v4902_v27, %v4902_v27  ;;  %4358 = vmatprep.subr.bf16.mxu0 %v4357_v1  ;;  %v1090_v1 = vld [vmem:[%s5709_s12 + $0x38] sm:$0xff] }
  0xc7   : > { %4360 = vmatpush3.bf16.msra.mxu0 %v4359_v4  ;;  %v4371_v2 = vpack.c.bf16 %v1090_v1, %v1089_v63 }
  0xc8   : > { %v856_v29 = vcombine.high %v854_v28, %v854_v28  ;;  %v858_v30 = vsel %vm836_vm1, %v854_v28, 0.0  ;;  %v3719_v28 = vld [vmem:[%s5704_s6] ss:$0 sm:$0xff]  ;;  %s5708_s6 = sld [smem:[#allocation20_spill]]  ;;  %4361 = vmatprep.subr.bf16.mxu0 %v4668_v59 }
  0xc9   : > { %4372 = vmatpush3.bf16.msra.mxu1 %v4371_v2 }
  0xca   : > { %v859_v31 = vsel %vm836_vm1, %v856_v29, 0.0  ;;  %4373 = vmatprep.subr.bf16.mxu1 %v4668_v59 }
  0xcb   : > { %v860_v32 = vadd.f32 %v859_v31, %v858_v30 }
  0xcd   : > { %861 = vadd.xlane.f32.xlu0 %v860_v32 }
  0xce   : > { %v1051_v45 = vld [vmem:[%s5708_s6] sm:$0x7f]  ;;  %s820_s6 = sand.u32 1, %s4657_s4  }
  0xcf   : > { %s821_s8 = scalar_lea.vmem [#allocation3], %s820_s6  ;;  %s3637_s30 = scalar_lea.sflag [#allocation4], %s820_s6 }
  0xd0   : > { %s3649_s28 = sshll.u32 %s821_s8, 4  ;;  %s5598_s28 = int_to_ptr.vmem [resolvable:$true] %s3649_s28 }
  0xd1   : > { %s4603_s10 = scalar_lea.vmem %s5598_s28, 16 }
  0xd2   : > { %p4604_p11 = scmp.ne.s32.totalorder %s5598_s28, %s4603_s10 }
  0xd4   : > { %p4605_p12 = pnand %p4604_p11, %p4852_p5 }
  0xd6   : > { %p4606_p13 = pneg %p4605_p12 }
 0x15a   : > { %v862_v5 = vpop.xlane.xlu0 %861 }
 0x15b   : > { %v863_v6 = vmul.f32 0.00390625, %v862_v5 }
 0x15d   : > { %v864_v7 = vadd.f32 1e-05, %v863_v6 }
 0x15f   : > { %4569 = vrsqrt.f32 %v864_v7 }
 0x169   : > { %v4570_v16 = vpop.eup %4569 }
 0x16a   : > { %v873_v17 = vrot.slane %v4570_v16, %v4899_v23  ;;  %v4374_v16 = vpack.c.bf16 %v1092_v11, %v1091_v9  ;;  %v1864_v9 = vld [vmem:[%s5651_s13 + $0x8] sm:$0xff] }
 0x16c   : > { %v875_v19 = vmul.f32 %v873_v17, %v4902_v27  ;;  %v4386_v17 = vpack.c.bf16 %v1100_v13, %v1099_v12 }
 0x16e   : > { %v887_v21 = vmul.f32 %v885_v18, %v875_v19  ;;  %v1093_v18 = vld [vmem:[%s5709_s12 + $0x50] sm:$0xff] }
 0x170   : > { %v899_v22 = vadd.f32 %v897_v20, %v887_v21  ;;  %v1094_v20 = vld [vmem:[%s5709_s12 + $0x58] sm:$0xff]  ;;  %v1101_v21 = vld [vmem:[%s5709_s12 + $0x90] sm:$0xff] }
 0x172   : > { %v940_v24 = vcombine.high %v899_v22, %v899_v22 }
 0x174   : > { %1006 = vmatprep.mubr.f32.mxu0 %v940_v24  ;;  %v4377_v24 = vpack.c.bf16 %v1094_v20, %v1093_v18 }
 0x175   : > { %1007 = vmatmul.mubr.f32.vlgmr.msra.gmra.mrb[0].mxu0 %v899_v22  ;;  %v1102_v22 = vld [vmem:[%s5709_s12 + $0x98] sm:$0xff] }
 0x176   : > { %4363 = vmatpush3.bf16.msra.mxu0 %v4362_v57  ;;  %4015 = vmatprep.mubr.msk.f32.mxu0 %vm4669_vm5, %v4670_v3 }
 0x177   : > { %4364 = vmatprep.subr.bf16.mxu0 %v4668_v59 }
 0x17a   : > { %4366 = vmatpush3.bf16.msra.mxu0 %v4365_v0 }
 0x17b   : > { %4385 = vmatprep.subr.bf16.mxu0 %v4668_v59 }
 0x248   : > { %v3858_v25 = vpop.f32.mrb[0].mxu0 }
 0x249   : > { %v3859_v26 = vpop.f32.mrb[1].mxu0 }
 0x24a   : > { %v3860_v29 = vadd.f32 %v3859_v26, %v3858_v25  ;;  %v4389_v25 = vpack.c.bf16 %v1102_v22, %v1101_v21  ;;  %v1095_v26 = vld [vmem:[%s5709_s12 + $0x60] sm:$0xff] }
 0x24c   : > { %v1009_v30 = vadd.f32 %v3860_v29, %v3719_v28  ;;  %v1096_v28 = vld [vmem:[%s5709_s12 + $0x68] sm:$0xff] }
 0x24d   : > { %v4380_v29 = vpack.c.bf16 %v1096_v28, %v1095_v26 }
 0x24e   : > { %v1015_v23 = vsel %vm1014_vm2, %v1009_v30, 0.0 }
 0x24f   : > { %1016 = vadd.xlane.f32.xlu1 %v1015_v23  ;;  %v1098_v23 = vld [vmem:[%s5709_s12 + $0x78] sm:$0xff] }
 0x2dc   : > { %v1017_v31 = vpop.xlane.xlu1 %1016 }
 0x2dd   : > { %v1019_v27 = vmul.f32 0.03125, %v1017_v31 }
 0x2df   : > { %v1020_v32 = vsub.f32 %v1009_v30, %v1019_v27  ;;  %v1097_v30 = vld [vmem:[%s5709_s12 + $0x70] sm:$0xff]  ;;  %v1103_v27 = vld [vmem:[%s5709_s12 + $0xa0] sm:$0xff] }
 0x2e0   : > { %v4383_v31 = vpack.c.bf16 %v1098_v23, %v1097_v30 }
 0x2e1   : > { %v1021_v33 = vmul.f32 %v1020_v32, %v1020_v32 }
 0x2e3   : > { %v1022_v34 = vsel %vm1014_vm2, %v1021_v33, 0.0 }
 0x2e4   : > { %1023 = vadd.xlane.f32.xlu1 %v1022_v34  ;;  %v1105_v34 = vld [vmem:[%s5709_s12 + $0xb0] sm:$0xff] }
 0x371   : > { %v1024_v36 = vpop.xlane.xlu1 %1023 }
 0x372   : > { %v1025_v37 = vmul.f32 0.03125, %v1024_v36  ;;  %v4395_v36 = vpack.c.bf16 %v1106_v35, %v1105_v34 }
 0x374   : > { %v1026_v38 = vadd.f32 1e-05, %v1025_v37 }
 0x376   : > { %4571 = vrsqrt.f32 %v1026_v38 }
 0x380   : > { %v4572_v39 = vpop.eup %4571 }
 0x381   : > { %v1028_v41 = vmul.f32 %v4572_v39, %v1020_v32  ;;  %v1104_v32 = vld [vmem:[%s5709_s12 + $0xa8] sm:$0xff] }
 0x382   : > { %v4392_v33 = vpack.c.bf16 %v1104_v32, %v1103_v27 }
 0x383   : > { %v1035_v43 = vmul.f32 %v3720_v40, %v1028_v41 }
 0x385   : > { %v1042_v44 = vadd.f32 %v3721_v42, %v1035_v43 }
 0x387   : > { %1043 = vst.msk [vmem:[#allocation2] sm:$0xf] %vm1014_vm2, %v1042_v44 }
 0x38e   : > { %v1050_v46 = vld [vmem:[#allocation2] sm:$0x7f] }
 0x38f   : > { %v5008_v47 = vadd.f32 %v1051_v45, %v1050_v46 }
 0x391   : > { %v1056_v48 = vsel %vm1055_vm4, %v5008_v47, 0.0 }
 0x392   : > { %1057 = vadd.xlane.f32.xlu0 %v1056_v48 }
 0x41f   : > { %v1058_v49 = vpop.xlane.xlu0 %1057 }
 0x420   : > { %v1059_v50 = vmul.f32 0.03125, %v1058_v49 }
 0x422   : > { %v1060_v51 = vsub.f32 %v5008_v47, %v1059_v50 }
 0x424   : > { %v1061_v52 = vmul.f32 %v1060_v51, %v1060_v51 }
 0x426   : > { %v1062_v53 = vsel %vm1055_vm4, %v1061_v52, 0.0 }
 0x427   : > { %1063 = vadd.xlane.f32.xlu1 %v1062_v53 }
 0x4b4   : > { %v1064_v4 = vpop.xlane.xlu1 %1063 }
 0x4b5   : > { %v1065_v5 = vmul.f32 0.03125, %v1064_v4 }
 0x4b7   : > { %v1066_v6 = vadd.f32 1e-05, %v1065_v5 }
 0x4b9   : > { %4573 = vrsqrt.f32 %v1066_v6 }
 0x4c3   : > { %v4574_v7 = vpop.eup %4573 }
 0x4c4   : > { %v1068_v10 = vmul.f32 %v4574_v7, %v1060_v51 }
 0x4c6   : > { %v1075_v15 = vmul.f32 %v3722_v8, %v1068_v10  ;;  %v1863_v8 = vld [vmem:[%s5651_s13] sm:$0xff] }
 0x4c7   : > { %v4398_v11 = vpack.c.bf16 %v1864_v9, %v1863_v8 }
 0x4c8   : > { %v1082_v19 = vadd.f32 %v3723_v14, %v1075_v15  ;;  %v1865_v15 = vld [vmem:[%s5651_s13 + $0x10] sm:$0xff] }
 0x4ca   : > { %4016 = vmatmul.mubr.msk.f32.vlgmr.msra.gmra.mrb[2].mxu0 %vm1107_vm6, %v1082_v19  ;;  %4027 = vmatmul.mubr.msk.f32.vlgmr.msra.gmra.mrb[0].mxu1 %vm1107_vm6, %v1082_v19 }
 0x4cb   : > { %4375 = vmatpush3.bf16.msra.mxu1 %v4374_v16  ;;  %4387 = vmatpush3.bf16.msra.mxu0 %v4386_v17  ;;  %v1866_v16 = vld [vmem:[%s5651_s13 + $0x18] sm:$0xff] }
 0x4cc   : > { %4376 = vmatprep.subr.bf16.mxu1 %v4668_v59  ;;  %4388 = vmatprep.subr.bf16.mxu0 %v4668_v59  ;;  %v4401_v17 = vpack.c.bf16 %v1866_v16, %v1865_v15 }
 0x4cd   : > { %4037 = vmatprep.mubr.msk.f32.mxu1 %vm4669_vm5, %v4670_v3  ;;  %4059 = vmatprep.mubr.msk.f32.mxu0 %vm4669_vm5, %v4670_v3 }
 0x4cf   : > { %4378 = vmatpush3.bf16.msra.mxu1 %v4377_v24  ;;  %4390 = vmatpush3.bf16.msra.mxu0 %v4389_v25 }
 0x4d0   : > { %4379 = vmatprep.subr.bf16.mxu1 %v4668_v59  ;;  %4073 = vmatprep.subr.mxu0 %v4670_v3 }
 0x4d2   : > { %4038 = vmatmul.mubr.msk.f32.vlgmr.msra.gmra.mrb[2].mxu1 %vm1107_vm6, %v1082_v19  ;;  %4060 = vmatmul.mubr.msk.f32.vlgmr.msra.gmra.mrb[4].mxu0 %vm1107_vm6, %v1082_v19 }
 0x4d3   : > { %4381 = vmatpush3.bf16.msra.mxu1 %v4380_v29  ;;  %4048 = vmatprep.mubr.msk.f32.mxu1 %vm4669_vm5, %v4670_v3  ;;  %v3740_v29 = vld [vmem:[%s5652_s14] ss:$0 sm:$0xff] }
 0x4d4   : > { %4382 = vmatprep.subr.bf16.mxu1 %v4668_v59  ;;  %4075 = vmatprep.mubr.msk.f32.mxu0 %vm4669_vm5, %v4670_v3 }
 0x4d7   : > { %4384 = vmatpush3.bf16.msra.mxu1 %v4383_v31 }
 0x4d8   : > { %4391 = vmatprep.subr.bf16.mxu1 %v4668_v59 }
 0x4da   : > { %4049 = vmatmul.mubr.msk.f32.vlgmr.msra.gmra.mrb[4].mxu1 %vm1107_vm6, %v1082_v19 }
 0x4db   : > { %4393 = vmatpush3.bf16.msra.mxu1 %v4392_v33  ;;  %4070 = vmatprep.mubr.msk.f32.mxu1 %vm4669_vm5, %v4670_v3 }
 0x4dc   : > { %4394 = vmatprep.subr.bf16.mxu1 %v4668_v59 }
 0x4df   : > { %4396 = vmatpush3.bf16.msra.mxu1 %v4395_v36 }
 0x4e0   : > { %4078 = vmatprep.subr.mxu1 %v4670_v3 }
 0x4e2   : > { %4071 = vmatmul.mubr.msk.f32.vlgmr.msra.gmra.mrb[6].mxu1 %vm1107_vm6, %v1082_v19 }
 0x4e3   : > { %4080 = vmatprep.mubr.msk.f32.mxu1 %vm4669_vm5, %v4670_v3 }
 0x59d   : > { %v1177_v37 = vpop.f32.mrb[2].mxu0  ;;  %v1247_v38 = vpop.f32.mrb[0].mxu1 }
 0x59e   : > { %v4017_v39 = vpop.f32.mrb[3].mxu0  ;;  %v4028_v40 = vpop.f32.mrb[1].mxu1  ;;  %v1531_v45 = vmul.f32 0.25, %v1177_v37  ;;  %v1532_v49 = vmul.f32 0.25, %v1247_v38  ;;  %v2054_v38 = vld [vmem:[%s5655_s17] sm:$0xff] }
 0x59f   : > { %v2056_v40 = vld [vmem:[%s5655_s17 + $0x10] sm:$0xff] }
 0x5a5   : > { %v1317_v41 = vpop.f32.mrb[2].mxu1  ;;  %v1457_v42 = vpop.f32.mrb[4].mxu0 }
 0x5a6   : > { %v4039_v43 = vpop.f32.mrb[3].mxu1  ;;  %v4061_v44 = vpop.f32.mrb[5].mxu0  ;;  %4074 = vmatpush3.xpose.msk.msra.mxu0 %vm1533_vm7, %v1317_v41  ;;  %v2057_v41 = vld [vmem:[%s5655_s17 + $0x18] sm:$0xff] }
 0x5a7   : > { %4083 = vmatprep.subr.mxu0 %v4670_v3 }
 0x5a9   : > { %4076 = vmatmul.mubr.msk.f32.vlgmr.msra.gmra.mrb[6].mxu0 %vm1533_vm7, %v1531_v45 }
 0x5aa   : > { %4084 = vmatpush3.msk.msra.mxu0 %vm1713_vm8, %v1457_v42  ;;  %4085 = vmatprep.mubr.msk.f32.mxu0 %vm4669_vm5, %v4670_v3  ;;  %v4407_v42 = vpack.c.bf16 %v2057_v41, %v2056_v40  ;;  %v3756_v41 = vld [vmem:[%s5709_s12 + $0xe8] sm:$0xff] }
 0x5ab   : > { %4397 = vmatprep.subr.bf16.mxu0 %v4668_v59 }
 0x5ad   : > { %v1387_v46 = vpop.f32.mrb[4].mxu1 }
 0x5ae   : > { %v4050_v48 = vpop.f32.mrb[5].mxu1  ;;  %4079 = vmatpush3.xpose.msk.msra.mxu1 %vm1533_vm7, %v1387_v46 }
 0x5af   : > { %4088 = vmatprep.subr.mxu1 %v4670_v3  ;;  %v3741_v48 = vld [vmem:[%s5653_s15] ss:$0 sm:$0xff] }
 0x5b1   : > { %4081 = vmatmul.mubr.msk.f32.vlgmr.msra.gmra.mrb[8].mxu1 %vm1533_vm7, %v1532_v49 }
 0x5b2   : > { %4090 = vmatprep.mubr.msk.f32.mxu1 %vm4669_vm5, %v4670_v3 }
 0x5b5   : > { %v1527_v50 = vpop.f32.mrb[6].mxu1 }
 0x5b6   : > { %v4072_v51 = vpop.f32.mrb[7].mxu1  ;;  %4089 = vmatpush3.msk.msra.mxu1 %vm1713_vm8, %v1527_v50  ;;  %v3742_v50 = vld [vmem:[%s5654_s16] ss:$0 sm:$0xff] }
 0x5b7   : > { %4400 = vmatprep.subr.bf16.mxu1 %v4668_v59 }
 0x67c   : > { %v1606_v52 = vpop.f32.mrb[6].mxu0 }
 0x67d   : > { %v4077_v53 = vpop.f32.mrb[7].mxu0  ;;  %v1687_v54 = vsel %vm1686_vm9, %v1606_v52, -inf }
 0x67e   : > { %1688 = vmax.xlane.f32.xlu0 %v1687_v54  ;;  %v2143_v53 = vld [vmem:[%s5657_s19] sm:$0xff]  ;;  %v2144_v54 = vld [vmem:[%s5657_s19 + $0x8] sm:$0xff] }
 0x684   : > { %v1682_v55 = vpop.f32.mrb[8].mxu1 }
 0x685   : > { %v4082_v56 = vpop.f32.mrb[9].mxu1  ;;  %v1690_v57 = vsel %vm1686_vm9, %v1682_v55, -inf }
 0x686   : > { %1691 = vmax.xlane.f32.xlu1 %v1690_v57  ;;  %v2145_v56 = vld [vmem:[%s5657_s19 + $0x10] sm:$0xff]  ;;  %v2146_v57 = vld [vmem:[%s5657_s19 + $0x18] sm:$0xff] }
 0x70b   : > { %v1689_v58 = vpop.xlane.xlu0 %1688 }
 0x70c   : > { %v1693_v60 = vsub.f32 %v1606_v52, %v1689_v58  ;;  %v4413_v58 = vpack.c.bf16 %v2146_v57, %v2145_v56  ;;  %v3763_v56 = vld [vmem:[%s5709_s12 + $0x120] sm:$0xff]  ;;  %v3764_v57 = vld [vmem:[%s5709_s12 + $0x128] sm:$0xff] }
 0x70e   : > { %v1695_v61 = vmul.f32 1.442695, %v1693_v60  ;;  %v2147_v60 = vld [vmem:[%s5657_s19 + $0x20] sm:$0xff] }
 0x710   : > { %4575 = vpow2.f32 %v1695_v61  ;;  %v2148_v61 = vld [vmem:[%s5657_s19 + $0x28] sm:$0xff] }
 0x713   : > { %v1692_v62 = vpop.xlane.xlu1 %1691 }
 0x714   : > { %v1694_v63 = vsub.f32 %v1682_v55, %v1692_v62  ;;  %v4410_v55 = vpack.c.bf16 %v2144_v54, %v2143_v53  ;;  %v4416_v62 = vpack.c.bf16 %v2148_v61, %v2147_v60  ;;  %v3770_v53 = vld [vmem:[%s5709_s12 + $0x158] sm:$0xff]  ;;  %v3765_v60 = vld [vmem:[%s5709_s12 + $0x130] sm:$0xff] }
 0x715   : > { %v3766_v61 = vld [vmem:[%s5709_s12 + $0x138] sm:$0xff] }
 0x716   : > { %v1697_v0 = vmul.f32 1.442695, %v1694_v63  ;;  %v2149_v63 = vld [vmem:[%s5657_s19 + $0x30] sm:$0xff] }
 0x718   : > { %4577 = vpow2.f32 %v1697_v0  ;;  %v2150_v0 = vld [vmem:[%s5657_s19 + $0x38] sm:$0xff] }
 0x71a   : > { %v4576_v1 = vpop.eup %4575 }
 0x71b   : > { %v1699_v2 = vsel %vm1686_vm9, %v4576_v1, 0.0 }
 0x71c   : > { %1700 = vadd.xlane.f32.xlu0 %v1699_v2  ;;  %v3743_v2 = vld [vmem:[%s5656_s18] ss:$0 sm:$0xff] }
 0x722   : > { %v4578_v4 = vpop.eup %4577 }
 0x723   : > { %v1702_v5 = vsel %vm1686_vm9, %v4578_v4, 0.0 }
 0x724   : > { %1703 = vadd.xlane.f32.xlu1 %v1702_v5 }
 0x7a9   : > { %v1701_v6 = vpop.xlane.xlu0 %1700 }
 0x7aa   : > { %4579 = vrcp.f32 %v1701_v6 }
 0x7b1   : > { %v1704_v7 = vpop.xlane.xlu1 %1703 }
 0x7b2   : > { %4581 = vrcp.f32 %v1704_v7 }
 0x7b4   : > { %v4580_v10 = vpop.eup %4579 }
 0x7b5   : > { %v1707_v12 = vmul.f32 %v4580_v10, %v4576_v1  ;;  %v4419_v1 = vpack.c.bf16 %v2150_v0, %v2149_v63  ;;  %v3771_v63 = vld [vmem:[%s5709_s12 + $0x160] sm:$0xff]  ;;  %v3772_v0 = vld [vmem:[%s5709_s12 + $0x168] sm:$0xff] }
 0x7b7   : > { %4086 = vmatmul.mubr.msk.f32.vlgmr.msra.gmra.mrb[8].mxu0 %vm1709_vm10, %v1707_v12  ;;  %v3745_v12 = vld [vmem:[%s5658_s20] ss:$0 sm:$0xff] }
 0x7b8   : > { %4399 = vmatpush3.bf16.msra.mxu0 %v4398_v11  ;;  %4097 = vmatprep.mubr.msk.f32.mxu0 %vm4669_vm5, %v4670_v3 }
 0x7b9   : > { %4403 = vmatprep.subr.bf16.mxu0 %v4668_v59 }
 0x7bc   : > { %v4582_v13 = vpop.eup %4581 }
 0x7bd   : > { %v1708_v14 = vmul.f32 %v4582_v13, %v4578_v4 }
 0x7bf   : > { %4091 = vmatmul.mubr.msk.f32.vlgmr.msra.gmra.mrb[10].mxu1 %vm1709_vm10, %v1708_v14 }
 0x7c0   : > { %4104 = vmatprep.mubr.msk.f32.mxu1 %vm4669_vm5, %v4670_v3  ;;  %4402 = vmatpush3.bf16.msra.mxu1 %v4401_v17 }
 0x7c1   : > { %4409 = vmatprep.subr.bf16.mxu1 %v4668_v59 }
 0x88a   : > { %v1783_v18 = vpop.f32.mrb[8].mxu0 }
 0x88b   : > { %v4087_v19 = vpop.f32.mrb[9].mxu0  ;;  %4098 = vmatmul.mubr.msk.f32.vlgmr.msra.gmra.mrb[10].mxu0 %vm1533_vm7, %v1783_v18 }
 0x88c   : > { %4115 = vmatprep.mubr.msk.f32.mxu0 %vm4669_vm5, %v4670_v3 }
 0x892   : > { %v1859_v20 = vpop.f32.mrb[10].mxu1 }
 0x893   : > { %v4092_v21 = vpop.f32.mrb[11].mxu1  ;;  %4105 = vmatmul.mubr.msk.f32.vlgmr.msra.gmra.mrb[12].mxu1 %vm1533_vm7, %v1859_v20 }
 0x894   : > { %4134 = vmatprep.mubr.msk.f32.mxu1 %vm4669_vm5, %v4670_v3  ;;  %4411 = vmatpush3.bf16.msra.mxu1 %v4410_v55 }
 0x895   : > { %4412 = vmatprep.subr.bf16.mxu1 %v4668_v59 }
 0x898   : > { %4414 = vmatpush3.bf16.msra.mxu1 %v4413_v58  ;;  %v4440_v58 = vpack.c.bf16 %v3764_v57, %v3763_v56 }
 0x899   : > { %4415 = vmatprep.subr.bf16.mxu1 %v4668_v59 }
 0x89c   : > { %4417 = vmatpush3.bf16.msra.mxu1 %v4416_v62  ;;  %v4443_v62 = vpack.c.bf16 %v3766_v61, %v3765_v60 }
 0x89d   : > { %4418 = vmatprep.subr.bf16.mxu1 %v4668_v59 }
 0x8a0   : > { %4420 = vmatpush3.bf16.msra.mxu1 %v4419_v1  ;;  %v4452_v1 = vpack.c.bf16 %v3772_v0, %v3771_v63 }
 0x8a1   : > { %4433 = vmatprep.subr.bf16.mxu1 %v4668_v59 }
 0x95e   : > { %v1936_v22 = vpop.f32.mrb[10].mxu0 }
 0x95f   : > { %v4099_v24 = vpop.f32.mrb[11].mxu0  ;;  %v2013_v26 = vsel %vm1055_vm4, %v1936_v22, 0.0 }
 0x960   : > { %v3751_v24 = vld [vmem:[%s5709_s12 + $0xc0] sm:$0xff] }
 0x966   : > { %v2009_v25 = vpop.f32.mrb[12].mxu1 }
 0x967   : > { %v2014_v28 = vsel %vm1055_vm4, %v2009_v25, 0.0  ;;  %v4106_v30 = vpop.f32.mrb[13].mxu1  ;;  %v3752_v25 = vld [vmem:[%s5709_s12 + $0xc8] sm:$0xff] }
 0x968   : > { %v2015_v23 = vadd.f32 %v2014_v28, %v2013_v26  ;;  %v3759_v26 = vld [vmem:[%s5709_s12 + $0x100] sm:$0xff]  ;;  %v4422_v28 = vpack.c.bf16 %v3752_v25, %v3751_v24 }
 0x96a   : > { %v2023_v31 = vadd.f32 %v3740_v29, %v2015_v23  ;;  %v3760_v29 = vld [vmem:[%s5709_s12 + $0x108] sm:$0xff]  ;;  %v3753_v23 = vld [vmem:[%s5709_s12 + $0xd0] sm:$0xff] }
 0x96b   : > { %v4434_v30 = vpack.c.bf16 %v3760_v29, %v3759_v26 }
 0x96c   : > { %v5178_v27 = vadd.f32 %v2023_v31, %v5008_v47  ;;  %v2055_v47 = vld [vmem:[%s5655_s17 + $0x8] sm:$0xff]  ;;  %v3754_v31 = vld [vmem:[%s5709_s12 + $0xd8] sm:$0xff] }
 0x96d   : > { %v4404_v39 = vpack.c.bf16 %v2055_v47, %v2054_v38  ;;  %v3749_v47 = vld [vmem:[%s5710_s29 + $0x1] ss:$0 sm:$0xff] }
 0x96e   : > { %v2027_v32 = vsel %vm1055_vm4, %v5178_v27, 0.0 }
 0x96f   : > { %2028 = vadd.xlane.f32.xlu0 %v2027_v32  ;;  %4405 = vmatpush3.bf16.msra.mxu0 %v4404_v39  ;;  %v4425_v32 = vpack.c.bf16 %v3754_v31, %v3753_v23  ;;  %v3755_v39 = vld [vmem:[%s5709_s12 + $0xe0] sm:$0xff] }
 0x970   : > { %4406 = vmatprep.subr.bf16.mxu0 %v4668_v59 }
 0x973   : > { %4408 = vmatpush3.bf16.msra.mxu0 %v4407_v42  ;;  %v3767_v42 = vld [vmem:[%s5709_s12 + $0x140] sm:$0xff] }
 0x974   : > { %4421 = vmatprep.subr.bf16.mxu0 %v4668_v59 }
 0x9fc   : > { %v2029_v33 = vpop.xlane.xlu0 %2028 }
 0x9fd   : > { %v2030_v34 = vmul.f32 0.03125, %v2029_v33  ;;  %v3762_v33 = vld [vmem:[%s5709_s12 + $0x118] sm:$0xff] }
 0x9ff   : > { %v2031_v35 = vsub.f32 %v5178_v27, %v2030_v34 }
 0xa01   : > { %v2032_v36 = vmul.f32 %v2031_v35, %v2031_v35 }
 0xa03   : > { %v2033_v37 = vsel %vm1055_vm4, %v2032_v36, 0.0 }
 0xa04   : > { %2034 = vadd.xlane.f32.xlu1 %v2033_v37 }
 0xa91   : > { %v2035_v43 = vpop.xlane.xlu1 %2034 }
 0xa92   : > { %v2036_v44 = vmul.f32 0.03125, %v2035_v43  ;;  %v3768_v43 = vld [vmem:[%s5709_s12 + $0x148] sm:$0xff] }
 0xa94   : > { %v2037_v45 = vadd.f32 1e-05, %v2036_v44  ;;  %v3750_v44 = vld [vmem:[%s5712_s27 + $0x1] ss:$0 sm:$0xff] }
 0xa96   : > { %4583 = vrsqrt.f32 %v2037_v45 }
 0xaa0   : > { %v4584_v46 = vpop.eup %4583 }
 0xaa1   : > { %v2039_v49 = vmul.f32 %v4584_v46, %v2031_v35  ;;  %v4428_v46 = vpack.c.bf16 %v3756_v41, %v3755_v39 }
 0xaa3   : > { %v2046_v51 = vmul.f32 %v3741_v48, %v2039_v49  ;;  %v4446_v48 = vpack.c.bf16 %v3768_v43, %v3767_v42  ;;  %v3757_v49 = vld [vmem:[%s5709_s12 + $0xf0] sm:$0xff] }
 0xaa5   : > { %v2053_v52 = vadd.f32 %v3742_v50, %v2046_v51  ;;  %v3758_v51 = vld [vmem:[%s5709_s12 + $0xf8] sm:$0xff] }
 0xaa6   : > { %v4431_v54 = vpack.c.bf16 %v3758_v51, %v3757_v49 }
 0xaa7   : > { %4116 = vmatmul.mubr.msk.f32.vlgmr.msra.gmra.mrb[12].mxu0 %vm1107_vm6, %v2053_v52  ;;  %v3769_v52 = vld [vmem:[%s5709_s12 + $0x150] sm:$0xff] }
 0xaa8   : > { %4145 = vmatprep.mubr.msk.f32.mxu0 %vm4669_vm5, %v4670_v3  ;;  %4423 = vmatpush3.bf16.msra.mxu0 %v4422_v28  ;;  %v4449_v55 = vpack.c.bf16 %v3770_v53, %v3769_v52 }
 0xaa9   : > { %4424 = vmatprep.subr.bf16.mxu0 %v4668_v59 }
 0xaac   : > { %4426 = vmatpush3.bf16.msra.mxu0 %v4425_v32 }
 0xaad   : > { %4427 = vmatprep.subr.bf16.mxu0 %v4668_v59 }
 0xb7a   : > { %v2134_v4 = vpop.f32.mrb[12].mxu0 }
 0xb7b   : > { %v2135_v5 = vadd.f32 %v3743_v2, %v2134_v4  ;;  %v4117_v6 = vpop.f32.mrb[13].mxu0  ;;  %v3773_v2 = vld [vmem:[%s5709_s12 + $0x170] sm:$0xff]  ;;  %v3774_v4 = vld [vmem:[%s5709_s12 + $0x178] sm:$0xff] }
 0xb7d   : > { %v2139_v7 = vmul.f32 0.70710677, %v2135_v5  ;;  %v2138_v9 = vmul.f32 0.5, %v2135_v5  ;;  %v4455_v5 = vpack.c.bf16 %v3774_v4, %v3773_v2 }
 0xb7f   : > { %4585 = verf.f32 %v2139_v7 }
 0xb89   : > { %v4586_v8 = vpop.eup %4585 }
 0xb8a   : > { %v2141_v10 = vadd.f32 1.0, %v4586_v8 }
 0xb8c   : > { %v2142_v11 = vmul.f32 %v2141_v10, %v2138_v9 }
 0xb8e   : > { %4135 = vmatmul.mubr.msk.f32.vlgmr.msra.gmra.mrb[14].mxu1 %vm2158_vm11, %v2142_v11 }
 0xb8f   : > { %4167 = vmatprep.mubr.msk.f32.mxu1 %vm4669_vm5, %v4670_v3  ;;  %4435 = vmatpush3.bf16.msra.mxu1 %v4434_v30 }
 0xb90   : > { %4436 = vmatprep.subr.bf16.mxu1 %v4668_v59 }
 0xc61   : > { %v2228_v13 = vpop.f32.mrb[14].mxu1 }
 0xc62   : > { %v2229_v14 = vadd.f32 %v3745_v12, %v2228_v13  ;;  %v4136_v15 = vpop.f32.mrb[15].mxu1 }
 0xc64   : > { %v5245_v16 = vadd.f32 %v2229_v14, %v5178_v27  ;;  %v3761_v27 = vld [vmem:[%s5709_s12 + $0x110] sm:$0xff] }
 0xc65   : > { %v4437_v34 = vpack.c.bf16 %v3762_v33, %v3761_v27 }
 0xc66   : > { %v2237_v17 = vsel %vm1055_vm4, %v5245_v16, 0.0 }
 0xc67   : > { %2238 = vadd.xlane.f32.xlu0 %v2237_v17  ;;  %4438 = vmatpush3.bf16.msra.mxu1 %v4437_v34 }
 0xc68   : > { %4445 = vmatprep.subr.bf16.mxu1 %v4668_v59 }
 0xcf4   : > { %v2239_v18 = vpop.xlane.xlu0 %2238 }
 0xcf5   : > { %v2240_v19 = vmul.f32 0.03125, %v2239_v18 }
 0xcf7   : > { %v2241_v20 = vsub.f32 %v5245_v16, %v2240_v19 }
 0xcf9   : > { %v2242_v21 = vmul.f32 %v2241_v20, %v2241_v20 }
 0xcfb   : > { %v2243_v22 = vsel %vm1055_vm4, %v2242_v21, 0.0 }
 0xcfc   : > { %2244 = vadd.xlane.f32.xlu1 %v2243_v22 }
 0xd89   : > { %v2245_v35 = vpop.xlane.xlu1 %2244 }
 0xd8a   : > { %v2246_v36 = vmul.f32 0.03125, %v2245_v35 }
 0xd8c   : > { %v2247_v37 = vadd.f32 1e-05, %v2246_v36 }
 0xd8e   : > { %4587 = vrsqrt.f32 %v2247_v37 }
 0xd98   : > { %v4588_v38 = vpop.eup %4587 }
 0xd99   : > { %v2249_v40 = vmul.f32 %v4588_v38, %v2241_v20  ;;  %v3789_v38 = vld [vmem:[%s5651_s13 + $0x20] sm:$0xff] }
 0xd9b   : > { %v2256_v45 = vmul.f32 %v3749_v47, %v2249_v40  ;;  %v3790_v47 = vld [vmem:[%s5651_s13 + $0x28] sm:$0xff] }
 0xd9c   : > { %v4458_v40 = vpack.c.bf16 %v3790_v47, %v3789_v38 }
 0xd9d   : > { %v2263_v50 = vadd.f32 %v3750_v44, %v2256_v45  ;;  %v3791_v45 = vld [vmem:[%s5651_s13 + $0x30] sm:$0xff] }
 0xd9f   : > { %4146 = vmatmul.mubr.msk.f32.vlgmr.msra.gmra.mrb[14].mxu0 %vm1107_vm6, %v2263_v50  ;;  %4168 = vmatmul.mubr.msk.f32.vlgmr.msra.gmra.mrb[16].mxu1 %vm1107_vm6, %v2263_v50 }
 0xda0   : > { %4429 = vmatpush3.bf16.msra.mxu0 %v4428_v46  ;;  %4447 = vmatpush3.bf16.msra.mxu1 %v4446_v48  ;;  %v3792_v46 = vld [vmem:[%s5651_s13 + $0x38] sm:$0xff] }
 0xda1   : > { %4430 = vmatprep.subr.bf16.mxu0 %v4668_v59  ;;  %4448 = vmatprep.subr.bf16.mxu1 %v4668_v59  ;;  %v4461_v48 = vpack.c.bf16 %v3792_v46, %v3791_v45 }
 0xda2   : > { %4156 = vmatprep.mubr.msk.f32.mxu0 %vm4669_vm5, %v4670_v3  ;;  %4189 = vmatprep.mubr.msk.f32.mxu1 %vm4669_vm5, %v4670_v3 }
 0xda4   : > { %4432 = vmatpush3.bf16.msra.mxu0 %v4431_v54  ;;  %4450 = vmatpush3.bf16.msra.mxu1 %v4449_v55 }
 0xda5   : > { %4439 = vmatprep.subr.bf16.mxu0 %v4668_v59  ;;  %4203 = vmatprep.subr.mxu1 %v4670_v3 }
 0xda7   : > { %4157 = vmatmul.mubr.msk.f32.vlgmr.msra.gmra.mrb[16].mxu0 %vm1107_vm6, %v2263_v50  ;;  %4190 = vmatmul.mubr.msk.f32.vlgmr.msra.gmra.mrb[18].mxu1 %vm1107_vm6, %v2263_v50 }
 0xda8   : > { %4441 = vmatpush3.bf16.msra.mxu0 %v4440_v58  ;;  %4178 = vmatprep.mubr.msk.f32.mxu0 %vm4669_vm5, %v4670_v3  ;;  %v3796_v58 = vld [vmem:[%s5652_s14 + $0x1] ss:$0 sm:$0xff] }
 0xda9   : > { %4442 = vmatprep.subr.bf16.mxu0 %v4668_v59  ;;  %4205 = vmatprep.mubr.msk.f32.mxu1 %vm4669_vm5, %v4670_v3 }
 0xdac   : > { %4444 = vmatpush3.bf16.msra.mxu0 %v4443_v62 }
 0xdad   : > { %4451 = vmatprep.subr.bf16.mxu0 %v4668_v59 }
 0xdaf   : > { %4179 = vmatmul.mubr.msk.f32.vlgmr.msra.gmra.mrb[18].mxu0 %vm1107_vm6, %v2263_v50 }
 0xdb0   : > { %4453 = vmatpush3.bf16.msra.mxu0 %v4452_v1  ;;  %4200 = vmatprep.mubr.msk.f32.mxu0 %vm4669_vm5, %v4670_v3 }
 0xdb1   : > { %4454 = vmatprep.subr.bf16.mxu0 %v4668_v59 }
 0xdb4   : > { %4456 = vmatpush3.bf16.msra.mxu0 %v4455_v5 }
 0xdb5   : > { %4213 = vmatprep.subr.mxu0 %v4670_v3 }
 0xdb7   : > { %4201 = vmatmul.mubr.msk.f32.vlgmr.msra.gmra.mrb[20].mxu0 %vm1107_vm6, %v2263_v50 }
 0xdb8   : > { %4215 = vmatprep.mubr.msk.f32.mxu0 %vm4669_vm5, %v4670_v3 }
 0xe72   : > { %v2358_v6 = vpop.f32.mrb[14].mxu0  ;;  %v2498_v7 = vpop.f32.mrb[16].mxu1 }
 0xe73   : > { %v2712_v8 = vmul.f32 0.25, %v2358_v6  ;;  %v4147_v9 = vpop.f32.mrb[15].mxu0  ;;  %v4169_v10 = vpop.f32.mrb[17].mxu1  ;;  %4204 = vmatpush3.xpose.msk.msra.mxu1 %vm1533_vm7, %v2498_v7  ;;  %v3801_v7 = vld [vmem:[%s5655_s17 + $0x20] sm:$0xff] }
 0xe74   : > { %4208 = vmatprep.subr.mxu1 %v4670_v3  ;;  %v3803_v9 = vld [vmem:[%s5655_s17 + $0x30] sm:$0xff]  ;;  %v3804_v10 = vld [vmem:[%s5655_s17 + $0x38] sm:$0xff] }
 0xe76   : > { %4206 = vmatmul.mubr.msk.f32.vlgmr.msra.gmra.mrb[20].mxu1 %vm1533_vm7, %v2712_v8 }
 0xe77   : > { %4210 = vmatprep.mubr.msk.f32.mxu1 %vm4669_vm5, %v4670_v3 }
 0xe7a   : > { %v2428_v11 = vpop.f32.mrb[16].mxu0  ;;  %v2638_v12 = vpop.f32.mrb[18].mxu1 }
 0xe7b   : > { %v4158_v13 = vpop.f32.mrb[17].mxu0  ;;  %v4191_v14 = vpop.f32.mrb[19].mxu1  ;;  %4214 = vmatpush3.msk.msra.mxu0 %vm1713_vm8, %v2638_v12  ;;  %v2713_v18 = vmul.f32 0.25, %v2428_v11  ;;  %v4467_v11 = vpack.c.bf16 %v3804_v10, %v3803_v9  ;;  %v3468_v9 = vld [vmem:[%s5661_s23 + $0x48] sm:$0xff] }
 0xe7c   : > { %4457 = vmatprep.subr.bf16.mxu0 %v4668_v59 }
 0xe82   : > { %v2568_v15 = vpop.f32.mrb[18].mxu0 }
 0xe83   : > { %v4180_v17 = vpop.f32.mrb[19].mxu0  ;;  %4209 = vmatpush3.xpose.msk.msra.mxu1 %vm1533_vm7, %v2568_v15 }
 0xe84   : > { %4218 = vmatprep.subr.mxu1 %v4670_v3  ;;  %v3799_v17 = vld [vmem:[%s5653_s15 + $0x1] ss:$0 sm:$0xff] }
 0xe86   : > { %4211 = vmatmul.mubr.msk.f32.vlgmr.msra.gmra.mrb[22].mxu1 %vm1533_vm7, %v2713_v18 }
 0xe87   : > { %4220 = vmatprep.mubr.msk.f32.mxu1 %vm4669_vm5, %v4670_v3 }
 0xe8a   : > { %v2708_v19 = vpop.f32.mrb[20].mxu0 }
 0xe8b   : > { %v4202_v20 = vpop.f32.mrb[21].mxu0  ;;  %4219 = vmatpush3.msk.msra.mxu1 %vm1713_vm8, %v2708_v19  ;;  %v3800_v19 = vld [vmem:[%s5654_s16 + $0x1] ss:$0 sm:$0xff] }
 0xe8c   : > { %4460 = vmatprep.subr.bf16.mxu1 %v4668_v59 }
 0xf49   : > { %v2786_v21 = vpop.f32.mrb[20].mxu1 }
 0xf4a   : > { %v4207_v22 = vpop.f32.mrb[21].mxu1  ;;  %v2866_v24 = vsel %vm1686_vm9, %v2786_v21, -inf }
 0xf4b   : > { %2867 = vmax.xlane.f32.xlu0 %v2866_v24  ;;  %v3808_v22 = vld [vmem:[%s5657_s19 + $0x40] sm:$0xff]  ;;  %v3809_v24 = vld [vmem:[%s5657_s19 + $0x48] sm:$0xff] }
 0xf59   : > { %v2862_v25 = vpop.f32.mrb[22].mxu1 }
 0xf5a   : > { %v4212_v26 = vpop.f32.mrb[23].mxu1  ;;  %v2869_v28 = vsel %vm1686_vm9, %v2862_v25, -inf }
 0xf5b   : > { %2870 = vmax.xlane.f32.xlu1 %v2869_v28  ;;  %v3810_v26 = vld [vmem:[%s5657_s19 + $0x50] sm:$0xff]  ;;  %v3811_v28 = vld [vmem:[%s5657_s19 + $0x58] sm:$0xff] }
 0xfd8   : > { %v2868_v29 = vpop.xlane.xlu0 %2867 }
 0xfd9   : > { %v2872_v30 = vsub.f32 %v2786_v21, %v2868_v29  ;;  %v4473_v29 = vpack.c.bf16 %v3811_v28, %v3810_v26  ;;  %v3554_v26 = vld [vmem:[%s5663_s25 + $0x38] sm:$0xff] }
 0xfdb   : > { %v2874_v23 = vmul.f32 1.442695, %v2872_v30  ;;  %v3812_v30 = vld [vmem:[%s5657_s19 + $0x60] sm:$0xff] }
 0xfdd   : > { %4589 = vpow2.f32 %v2874_v23  ;;  %v3813_v23 = vld [vmem:[%s5657_s19 + $0x68] sm:$0xff] }
 0xfe7   : > { %v4590_v31 = vpop.eup %4589 }
 0xfe8   : > { %v2871_v27 = vpop.xlane.xlu1 %2870  ;;  %v2878_v32 = vsel %vm1686_vm9, %v4590_v31, 0.0 }
 0xfe9   : > { %v2873_v33 = vsub.f32 %v2862_v25, %v2871_v27  ;;  %2879 = vadd.xlane.f32.xlu0 %v2878_v32  ;;  %v4470_v25 = vpack.c.bf16 %v3809_v24, %v3808_v22  ;;  %v3814_v27 = vld [vmem:[%s5657_s19 + $0x70] sm:$0xff]  ;;  %v3815_v32 = vld [vmem:[%s5657_s19 + $0x78] sm:$0xff]  ;;  %v3552_v22 = vld [vmem:[%s5663_s25 + $0x28] sm:$0xff] }
 0xfeb   : > { %v2876_v34 = vmul.f32 1.442695, %v2873_v33  ;;  %v4479_v33 = vpack.c.bf16 %v3815_v32, %v3814_v27  ;;  %v3558_v27 = vld [vmem:[%s5663_s25 + $0x58] sm:$0xff] }
 0xfed   : > { %4591 = vpow2.f32 %v2876_v34  ;;  %v3806_v34 = vld [vmem:[%s5656_s18 + $0x1] ss:$0 sm:$0xff] }
 0xff7   : > { %v4592_v35 = vpop.eup %4591 }
 0xff8   : > { %v2881_v36 = vsel %vm1686_vm9, %v4592_v35, 0.0 }
 0xff9   : > { %2882 = vadd.xlane.f32.xlu1 %v2881_v36 }
0x1076   : > { %v2880_v37 = vpop.xlane.xlu0 %2879 }
0x1077   : > { %4593 = vrcp.f32 %v2880_v37 }
0x1081   : > { %v4594_v39 = vpop.eup %4593 }
0x1082   : > { %v2886_v41 = vmul.f32 %v4594_v39, %v4590_v31  ;;  %v4476_v31 = vpack.c.bf16 %v3813_v23, %v3812_v30  ;;  %v3556_v30 = vld [vmem:[%s5663_s25 + $0x48] sm:$0xff] }
0x1084   : > { %4216 = vmatmul.mubr.msk.f32.vlgmr.msra.gmra.mrb[22].mxu0 %vm1709_vm10, %v2886_v41 }
0x1085   : > { %4459 = vmatpush3.bf16.msra.mxu0 %v4458_v40  ;;  %4227 = vmatprep.mubr.msk.f32.mxu0 %vm4669_vm5, %v4670_v3 }
0x1086   : > { %v2883_v42 = vpop.xlane.xlu1 %2882  ;;  %4463 = vmatprep.subr.bf16.mxu0 %v4668_v59 }
0x1087   : > { %4595 = vrcp.f32 %v2883_v42  ;;  %v3817_v42 = vld [vmem:[%s5658_s20 + $0x1] ss:$0 sm:$0xff] }
0x1091   : > { %v4596_v43 = vpop.eup %4595 }
0x1092   : > { %v2887_v44 = vmul.f32 %v4596_v43, %v4592_v35 }
0x1094   : > { %4221 = vmatmul.mubr.msk.f32.vlgmr.msra.gmra.mrb[24].mxu1 %vm1709_vm10, %v2887_v44 }
0x1095   : > { %4234 = vmatprep.mubr.msk.f32.mxu1 %vm4669_vm5, %v4670_v3  ;;  %4462 = vmatpush3.bf16.msra.mxu1 %v4461_v48 }
0x1096   : > { %4469 = vmatprep.subr.bf16.mxu1 %v4668_v59 }
0x1157   : > { %v2960_v49 = vpop.f32.mrb[22].mxu0 }
0x1158   : > { %v4217_v50 = vpop.f32.mrb[23].mxu0  ;;  %4228 = vmatmul.mubr.msk.f32.vlgmr.msra.gmra.mrb[24].mxu0 %vm1533_vm7, %v2960_v49 }
0x1159   : > { %4245 = vmatprep.mubr.msk.f32.mxu0 %vm4669_vm5, %v4670_v3 }
0x1167   : > { %v3036_v51 = vpop.f32.mrb[24].mxu1 }
0x1168   : > { %v4222_v52 = vpop.f32.mrb[25].mxu1  ;;  %4235 = vmatmul.mubr.msk.f32.vlgmr.msra.gmra.mrb[26].mxu1 %vm1533_vm7, %v3036_v51 }
0x1169   : > { %4264 = vmatprep.mubr.msk.f32.mxu1 %vm4669_vm5, %v4670_v3  ;;  %4471 = vmatpush3.bf16.msra.mxu1 %v4470_v25  ;;  %v3553_v25 = vld [vmem:[%s5663_s25 + $0x30] sm:$0xff] }
0x116a   : > { %4472 = vmatprep.subr.bf16.mxu1 %v4668_v59  ;;  %v4509_v28 = vpack.c.bf16 %v3554_v26, %v3553_v25 }
0x116d   : > { %4474 = vmatpush3.bf16.msra.mxu1 %v4473_v29  ;;  %v3555_v29 = vld [vmem:[%s5663_s25 + $0x40] sm:$0xff] }
0x116e   : > { %4475 = vmatprep.subr.bf16.mxu1 %v4668_v59  ;;  %v4512_v23 = vpack.c.bf16 %v3556_v30, %v3555_v29 }
0x1171   : > { %4477 = vmatpush3.bf16.msra.mxu1 %v4476_v31  ;;  %v3557_v31 = vld [vmem:[%s5663_s25 + $0x50] sm:$0xff] }
0x1172   : > { %4478 = vmatprep.subr.bf16.mxu1 %v4668_v59  ;;  %v4515_v32 = vpack.c.bf16 %v3558_v27, %v3557_v31 }
0x1175   : > { %4480 = vmatpush3.bf16.msra.mxu1 %v4479_v33  ;;  %v3559_v33 = vld [vmem:[%s5663_s25 + $0x60] sm:$0xff] }
0x1176   : > { %4499 = vmatprep.subr.bf16.mxu1 %v4668_v59 }
0x122b   : > { %v3114_v53 = vpop.f32.mrb[24].mxu0 }
0x122c   : > { %v4229_v54 = vpop.f32.mrb[25].mxu0  ;;  %v3191_v56 = vsel %vm1055_vm4, %v3114_v53, 0.0 }
0x123b   : > { %v3187_v55 = vpop.f32.mrb[26].mxu1 }
0x123c   : > { %v3192_v57 = vsel %vm1055_vm4, %v3187_v55, 0.0  ;;  %v4236_v60 = vpop.f32.mrb[27].mxu1 }
0x123d   : > { %v3193_v61 = vadd.f32 %v3192_v57, %v3191_v56  ;;  %v3459_v60 = vld [vmem:[%s5661_s23] sm:$0xff] }
0x123f   : > { %v3202_v62 = vadd.f32 %v3796_v58, %v3193_v61  ;;  %v3460_v61 = vld [vmem:[%s5661_s23 + $0x8] sm:$0xff] }
0x1241   : > { %v5409_v63 = vadd.f32 %v3202_v62, %v5245_v16  ;;  %v3802_v16 = vld [vmem:[%s5655_s17 + $0x28] sm:$0xff]  ;;  %v4482_v62 = vpack.c.bf16 %v3460_v61, %v3459_v60 }
0x1242   : > { %v4464_v8 = vpack.c.bf16 %v3802_v16, %v3801_v7  ;;  %v3466_v7 = vld [vmem:[%s5661_s23 + $0x38] sm:$0xff] }
0x1243   : > { %v3208_v0 = vsel %vm1055_vm4, %v5409_v63, 0.0 }
0x1244   : > { %3209 = vadd.xlane.f32.xlu0 %v3208_v0  ;;  %4465 = vmatpush3.bf16.msra.mxu0 %v4464_v8  ;;  %v3462_v0 = vld [vmem:[%s5661_s23 + $0x18] sm:$0xff]  ;;  %v3467_v8 = vld [vmem:[%s5661_s23 + $0x40] sm:$0xff] }
0x1245   : > { %4466 = vmatprep.subr.bf16.mxu0 %v4668_v59  ;;  %v4494_v10 = vpack.c.bf16 %v3468_v9, %v3467_v8 }
0x1248   : > { %4468 = vmatpush3.bf16.msra.mxu0 %v4467_v11  ;;  %v3469_v11 = vld [vmem:[%s5661_s23 + $0x50] sm:$0xff] }
0x1249   : > { %4481 = vmatprep.subr.bf16.mxu0 %v4668_v59 }
0x12d1   : > { %v3210_v1 = vpop.xlane.xlu0 %3209 }
0x12d2   : > { %v3211_v2 = vmul.f32 0.03125, %v3210_v1 }
0x12d4   : > { %v3212_v4 = vsub.f32 %v5409_v63, %v3211_v2  ;;  %v3463_v2 = vld [vmem:[%s5661_s23 + $0x20] sm:$0xff] }
0x12d6   : > { %v3213_v5 = vmul.f32 %v3212_v4, %v3212_v4 }
0x12d8   : > { %v3214_v6 = vsel %vm1055_vm4, %v3213_v5, 0.0 }
0x12d9   : > { %3215 = vadd.xlane.f32.xlu1 %v3214_v6  ;;  %v3465_v6 = vld [vmem:[%s5661_s23 + $0x30] sm:$0xff] }
0x12da   : > { %v4491_v16 = vpack.c.bf16 %v3466_v7, %v3465_v6 }
0x1366   : > { %v3216_v12 = vpop.xlane.xlu1 %3215 }
0x1367   : > { %v3217_v13 = vmul.f32 0.03125, %v3216_v12  ;;  %v3470_v12 = vld [vmem:[%s5661_s23 + $0x58] sm:$0xff] }
0x1369   : > { %v3218_v14 = vadd.f32 1e-05, %v3217_v13  ;;  %v4497_v13 = vpack.c.bf16 %v3470_v12, %v3469_v11 }
0x136b   : > { %4597 = vrsqrt.f32 %v3218_v14  ;;  %v3547_v14 = vld [vmem:[%s5663_s25] sm:$0xff] }
0x1375   : > { %v4598_v15 = vpop.eup %4597 }
0x1376   : > { %v3220_v18 = vmul.f32 %v4598_v15, %v3212_v4  ;;  %v3464_v4 = vld [vmem:[%s5661_s23 + $0x28] sm:$0xff] }
0x1377   : > { %v4488_v5 = vpack.c.bf16 %v3464_v4, %v3463_v2  ;;  %v3548_v15 = vld [vmem:[%s5663_s25 + $0x8] sm:$0xff] }
0x1378   : > { %v3227_v20 = vmul.f32 %v3799_v17, %v3220_v18  ;;  %v3549_v17 = vld [vmem:[%s5663_s25 + $0x10] sm:$0xff]  ;;  %v4500_v18 = vpack.c.bf16 %v3548_v15, %v3547_v14 }
0x137a   : > { %v3234_v21 = vadd.f32 %v3800_v19, %v3227_v20  ;;  %v3550_v19 = vld [vmem:[%s5663_s25 + $0x18] sm:$0xff] }
0x137b   : > { %v4503_v20 = vpack.c.bf16 %v3550_v19, %v3549_v17 }
0x137c   : > { %4246 = vmatmul.mubr.msk.f32.vlgmr.msra.gmra.mrb[26].mxu0 %vm1107_vm6, %v3234_v21  ;;  %v3551_v21 = vld [vmem:[%s5663_s25 + $0x20] sm:$0xff] }
0x137d   : > { %4291 = vmatprep.mubr.msk.f32.mxu0 %vm4669_vm5, %v4670_v3  ;;  %4483 = vmatpush3.bf16.msra.mxu0 %v4482_v62  ;;  %v4506_v24 = vpack.c.bf16 %v3552_v22, %v3551_v21 }
0x137e   : > { %4484 = vmatprep.subr.bf16.mxu0 %v4668_v59 }
0x144f   : > { %v3317_v35 = vpop.f32.mrb[26].mxu0 }
0x1450   : > { %v3318_v36 = vadd.f32 %v3806_v34, %v3317_v35  ;;  %v4247_v37 = vpop.f32.mrb[27].mxu0  ;;  %v3560_v34 = vld [vmem:[%s5663_s25 + $0x68] sm:$0xff] }
0x1451   : > { %v4518_v35 = vpack.c.bf16 %v3560_v34, %v3559_v33 }
0x1452   : > { %v3322_v38 = vmul.f32 0.70710677, %v3318_v36  ;;  %v3321_v39 = vmul.f32 0.5, %v3318_v36 }
0x1454   : > { %4599 = verf.f32 %v3322_v38 }
0x145e   : > { %v4600_v47 = vpop.eup %4599 }
0x145f   : > { %v3324_v40 = vadd.f32 1.0, %v4600_v47 }
0x1461   : > { %v3325_v41 = vmul.f32 %v3324_v40, %v3321_v39  ;;  %v3819_v39 = vld [vmem:[%s5659_s21] ss:$0 sm:$0xff] }
0x1463   : > { %4265 = vmatmul.mubr.msk.f32.vlgmr.msra.gmra.mrb[28].mxu1 %vm2158_vm11, %v3325_v41  ;;  %v3820_v41 = vld [vmem:[%s5660_s22] ss:$0 sm:$0xff] }
0x1464   : > { %4326 = vmatprep.mubr.msk.f32.mxu1 %vm4669_vm5, %v4670_v3  ;;  %4501 = vmatpush3.bf16.msra.mxu1 %v4500_v18 }
0x1465   : > { %4502 = vmatprep.subr.bf16.mxu1 %v4668_v59 }
0x1468   : > { %4504 = vmatpush3.bf16.msra.mxu1 %v4503_v20 }
0x1469   : > { %4505 = vmatprep.subr.bf16.mxu1 %v4668_v59 }
0x146c   : > { %4507 = vmatpush3.bf16.msra.mxu1 %v4506_v24 }
0x146d   : > { %4508 = vmatprep.subr.bf16.mxu1 %v4668_v59 }
0x1470   : > { %4510 = vmatpush3.bf16.msra.mxu1 %v4509_v28 }
0x1471   : > { %4511 = vmatprep.subr.bf16.mxu1 %v4668_v59 }
0x1474   : > { %4513 = vmatpush3.bf16.msra.mxu1 %v4512_v23 }
0x1475   : > { %4514 = vmatprep.subr.bf16.mxu1 %v4668_v59 }
0x1478   : > { %4516 = vmatpush3.bf16.msra.mxu1 %v4515_v32 }
0x1479   : > { %4517 = vmatprep.subr.bf16.mxu1 %v4668_v59 }
0x147c   : > { %4519 = vmatpush3.bf16.msra.mxu1 %v4518_v35 }
0x147d   : > { %4520 = vmatprep.subr.bf16.mxu1 %v4668_v59 }
0x1536   : > { %v3412_v43 = vpop.f32.mrb[28].mxu1 }
0x1537   : > { %v3413_v44 = vadd.f32 %v3817_v42, %v3412_v43  ;;  %v4266_v45 = vpop.f32.mrb[29].mxu1 }
0x1538   : > { %v3562_v45 = vld [vmem:[%s5663_s25 + $0x78] sm:$0xff] }
0x1539   : > { %v3416_v46 = vadd.f32 %v3413_v44, %v5409_v63  ;;  %v3461_v63 = vld [vmem:[%s5661_s23 + $0x10] sm:$0xff] }
0x153a   : > { %v4485_v1 = vpack.c.bf16 %v3462_v0, %v3461_v63  ;;  %v3561_v44 = vld [vmem:[%s5663_s25 + $0x70] sm:$0xff] }
0x153b   : > { %v3422_v48 = vrot.slane %v3416_v46, 7  ;;  %v3418_v49 = vrot.slane %v3416_v46, 1 }
0x153c   : > { %4486 = vmatpush3.bf16.msra.mxu0 %v4485_v1 }
0x153d   : > { %3423 = vrot.lane.b32.xlu1 %v3422_v48, %s4671_s11  ;;  %3419 = vrot.lane.b32.xlu0 %v3418_v49, %s4672_s3  ;;  %v3471_v48 = vld [vmem:[%s5662_s24] sm:$0x1]  ;;  %s3822_s3 = sshll.u32 %s4835_s9, 4  ;;  %s4673_s9 = smov [#allocation3]  }
0x153e   : > { %4487 = vmatprep.subr.bf16.mxu0 %v4668_v59  ;;  %s5596_s0 = scalar_lea.hbm %s5713_s5, %s3822_s3  ;;  %s4607_s11 = sshll.u32 %s4673_s9, 4  ;;  %s4608_s11 = int_to_ptr.vmem [resolvable:$false] %s4607_s11 }
0x153f   : > { %s4609_s12 = scalar_lea.vmem %s4608_s11, 32  ;;  %p4610_p0 = scmp.lt.s32.totalorder %s5598_s28, %s4608_s11 }
0x1540   : > { %4489 = vmatpush3.bf16.msra.mxu0 %v4488_v5  ;;  %p4611_p1 = scmp.lt.s32.totalorder %s4609_s12, %s4603_s10 }
0x1541   : > { %4490 = vmatprep.subr.bf16.mxu0 %v4668_v59 }
0x1542   : > { %p4612_p2 = por %p4611_p1, %p4610_p0 }
0x1544   : > { %4492 = vmatpush3.bf16.msra.mxu0 %v4491_v16  ;;  %p4613_p3 = pnand %p4612_p2, %p4606_p13 }
0x1545   : > { %4493 = vmatprep.subr.bf16.mxu0 %v4668_v59 }
0x1548   : > { %4495 = vmatpush3.bf16.msra.mxu0 %v4494_v10 }
0x1549   : > { %4496 = vmatprep.subr.bf16.mxu0 %v4668_v59 }
0x154c   : > { %4498 = vmatpush3.bf16.msra.mxu0 %v4497_v13 }
0x15af   : > { %v3424_v50 = vpop.permute.xlu1 %3423  ;;  %v3420_v51 = vpop.permute.xlu0 %3419 }
0x15b0   : > { %v3426_v3 = vsel %vm1107_vm6, %v3416_v46, %v3420_v51  ;;  %v4521_v46 = vpack.c.bf16 %v3562_v45, %v3561_v44 }
0x15b1   : > { %v3427_v52 = vsel %vm2158_vm11, %v3426_v3, %v3424_v50  ;;  %v3563_v3 = vld [vmem:[%s5664_s26] sm:$0x1] }
0x15b2   : > { %v3431_v53 = vsel %vm3430_vm12, %v3427_v52, 0.0  ;;  %4522 = vmatpush3.bf16.msra.mxu1 %v4521_v46 }
0x15b3   : > { %3432 = vadd.xlane.f32.xlu1 %v3431_v53 }
0x1640   : > { %v3433_v54 = vpop.xlane.xlu1 %3432 }
0x1641   : > { %v3435_v55 = vmul.f32 0.010416667, %v3433_v54 }
0x1643   : > { %v5478_v56 = vsub.f32 %v3427_v52, %v3435_v55 }
0x1645   : > { %v3437_v57 = vmul.f32 %v5478_v56, %v5478_v56 }
0x1647   : > { %v3438_v58 = vsel %vm3430_vm12, %v3437_v57, 0.0 }
0x1648   : > { %3439 = vadd.xlane.f32.xlu0 %v3438_v58 }
0x16d5   : > { %v3440_v36 = vpop.xlane.xlu0 %3439 }
0x16d6   : > { %v3441_v37 = vmul.f32 0.010416667, %v3440_v36 }
0x16d8   : > { %v3442_v38 = vadd.f32 1e-05, %v3441_v37 }
0x16da   : > { %4601 = vrsqrt.f32 %v3442_v38 }
0x16e4   : > { %v4602_v47 = vpop.eup %4601 }
0x16e5   : > { %v3444_v40 = vmul.f32 %v4602_v47, %v5478_v56 }
0x16e7   : > { %v3451_v42 = vmul.f32 %v3819_v39, %v3444_v40 }
0x16e9   : > { %v3458_v43 = vadd.f32 %v3820_v41, %v3451_v42 }
0x16eb   : > { %v3473_v59 = vrot.slane %v3458_v43, 5 }
0x16ed   : > { %4292 = vmatmul.mubr.msk.f32.vlgmr.msra.gmra.mrb[28].mxu0 %vm3474_vm13, %v3473_v59 }
0x17c0   : > { %v3543_v49 = vpop.f32.mrb[28].mxu0 }
0x17c1   : > { %v3544_v50 = vadd.f32 %v3543_v49, %v3471_v48  ;;  %v4293_v51 = vpop.f32.mrb[29].mxu0 }
0x17c3   : > { %4327 = vmatmul.mubr.f32.vlgmr.msra.gmra.mrb[30].mxu1 %v3544_v50 }
0x1896   : > { %v3630_v52 = vpop.f32.mrb[30].mxu1 }
0x1897   : > { %v3631_v53 = vadd.f32 %v3630_v52, %v3563_v3  ;;  %v4328_v54 = vpop.f32.mrb[31].mxu1 }
0x1899   : > { %3635 = vst.msk [vmem:[%s821_s8] sm:$0x1] %vm3634_vm14, %v3631_v53 }
0x189a   : > { %4616 = shalt.err (!%p4613_p3)
}
0x189b   : > { %s4617_s6 = scalar_lea.hbm %s5596_s0, 16  ;;  %s4621_s7 = scalar_lea.hbm %s5713_s5, 32 }
0x189c   : > { %p4618_p4 = scmp.ne.s32.totalorder %s5596_s0, %s4617_s6  ;;  %p4622_p9 = scmp.lt.u32.totalorder %s5596_s0, %s5713_s5 }
0x189d   : > { %p4623_p10 = scmp.lt.u32.totalorder %s4621_s7, %s4617_s6  ;;  %p4625_p12 = scmp.lt.u32.totalorder %s4617_s6, %s5596_s0 }
0x189e   : > { %p4619_p7 = pnand %p4618_p4, %p4852_p5 }
0x189f   : > { %p4624_p11 = por %p4623_p10, %p4622_p9 }
0x18a0   : > { %p4620_p8 = pneg %p4619_p7 }
0x18a1   : > { %p4626_p13 = por %p4625_p12, %p4624_p11 }
0x18a3   : > { %p4627_p0 = pnand %p4626_p13, %p4620_p8 }
0x18a5   : > { %4630 = shalt.err (!%p4627_p0)
}
0x18a6   : > { %4523 = dma.vmem_to_hbm [thread:$0]  (%p4852_p5), %s5598_s28, 16, %s5596_s0, %s3637_s30  }
0x18a7 PF: > { %s5714_s12 = sld [smem:[#allocation8_spill]]  ;;  %s5715_s10 = sld [smem:[#allocation6_spill]] }
0x18ad   : > { %p4529_p1 = scmp.ge.s32.totalorder %s5714_s12, 2  ;;  %s3661_s3 = sand.u32 1, %s5715_s10  }
0x18ae   : > { %s3662_s8 = scalar_lea.sflag [#allocation4], %s3661_s3 }
0x18af   : > { %p4526_p2 = pnand %p4529_p1, %p4856_p6 }
0x18b1   : > { %4648 = dma.done.wait (!%p4526_p2), %s3662_s8, 16  }
0x18b2   : > { %4650 = vsyncadd (!%p4526_p2), %s3662_s8, 4294967280  ;;  %s5717_s30 = sld [smem:[#allocation9_spill]]  ;;  %s5718_s6 = sld [smem:[#allocation7_spill]] }
0x18b3   : > { %s5719_s8 = sld [smem:[#allocation10_spill]]  ;;  %s5720_s7 = smov %s4657_s4 }
0x18b8   : > { %p37_p3 = scmp.ge.s32.totalorder %s5717_s30, 4   ;;  %s5721_s4 = smov %s5718_s6 }
0x18ba   :  { %39 = sbr.rel (!%p37_p3) target bundleno = 18 (0x12), region = 177 }
0x18c1   :  { %3666 = vsyncpa [#allocation4], 1 }
0x18c2   :  { %3668 = vsyncpa [#allocation4 + $0x1], 1 }

</bundles_post_ra>
